<compile_context>
chip_gen: v6e
topology: v6e:2x2x1
jax: 0.10.0
libtpu: 0.0.40
codegen_flags: <defaults>
</compile_context>

<pallas_src>
import functools

import jax
import jax.numpy as jnp
from jax.experimental import pallas as pl
from jax.experimental.pallas import tpu as pltpu


def _tpu_vmem_capacity():
    try:
        return int(pltpu.get_tpu_info().vmem_capacity_bytes)
    except Exception:
        return 64 * 1024 * 1024   # conservative default (v7x per-TensorCore)


_VMEM_CAP = _tpu_vmem_capacity()
# Scoped-VMEM limit: ~3/4 of physical (96 MiB on v5e/v6e's 128 MiB, 48 MiB on v7x).
VMEM_LIMIT = int(min(_VMEM_CAP * 3 // 4, 112 * 1024 * 1024))
# Working-set budget for tile picking (double-buffered tiles + f32 accumulator).
TILE_BUDGET = int(min(_VMEM_CAP * 5 // 8, 80 * 1024 * 1024))


def _pick_tile(dim, target, align):
    """Largest multiple of `align` that is <= target and divides dim, else full dim.

    The full-dim fallback is always BlockSpec-legal; _fit_tiles below additionally
    guards the dense working set against the VMEM budget."""
    if dim <= target:
        return dim
    t = (target // align) * align
    while t >= align:
        if dim % t == 0:
            return t
        t -= align
    return dim


def _fit_tiles(M, N, K, tm, tn, tk, *, fix_tn=False, budget=None):
    """Pick (tm, tn, tk) and shrink them until the double-buffered working set
    (bf16 x/w/out tiles + f32 accumulator [+ residual/LN tiles]) fits the budget."""
    budget = TILE_BUDGET if budget is None else budget
    tm = _pick_tile(M, tm, 8)
    tn = N if fix_tn else _pick_tile(N, tn, 128)
    tk = _pick_tile(K, tk, 128)

    def nbytes(tm_, tn_, tk_):
        base = 2 * 2 * (tm_ * tk_ + tk_ * tn_ + tm_ * tn_) + 4 * tm_ * tn_
        if fix_tn:
            base += 2 * 2 * tm_ * tn_   # residual tile (double-buffered bf16)
        return base

    while nbytes(tm, tn, tk) > budget:
        ntm, ntn, ntk = tm, tn, tk
        if tk >= max(tm, tn) and tk > 128:
            ntk = _pick_tile(K, tk // 2, 128)
        elif tm >= tn and tm > 8:
            ntm = _pick_tile(M, tm // 2, 8)
        elif (not fix_tn) and tn > 128:
            ntn = _pick_tile(N, tn // 2, 128)
        elif tm > 8:
            ntm = _pick_tile(M, tm // 2, 8)
        if (ntm, ntn, ntk) == (tm, tn, tk):
            break
        tm, tn, tk = ntm, ntn, ntk
    return tm, tn, tk


# ----------------------------------------------------------------------------
# Kernel: dense (tiled matmul, f32 accumulator) + bias, optional GELU,
#         optional fused residual-add + LayerNorm epilogue (requires tn == N)
# ----------------------------------------------------------------------------
def _dense_kernel(*refs, activation, fuse_ln, ln_eps):
    if fuse_ln:
        x_ref, w_ref, b_ref, r_ref, g_ref, beta_ref, o_ref, acc_ref = refs
    else:
        x_ref, w_ref, b_ref, o_ref, acc_ref = refs

    @pl.when(pl.program_id(2) == 0)
    def _():
        acc_ref[...] = jnp.zeros_like(acc_ref)

    # bf16 x bf16 -> f32 accumulation on the MXU.
    acc_ref[...] += jnp.dot(x_ref[...], w_ref[...],
                            preferred_element_type=jnp.float32)

    @pl.when(pl.program_id(2) == pl.num_programs(2) - 1)
    def _():
        h = acc_ref[...] + b_ref[...].astype(jnp.float32)
        if activation == "gelu":
            # TODO(synk): HF BERT uses exact erf-GELU; tanh approximation kept for
            # robust Mosaic lowering across versions.
            h = jax.nn.gelu(h, approximate=True)
        if fuse_ln:
            h = h + r_ref[...].astype(jnp.float32)
            mu = jnp.mean(h, axis=-1, keepdims=True)
            hc = h - mu
            var = jnp.mean(hc * hc, axis=-1, keepdims=True)
            h = (hc * jax.lax.rsqrt(var + ln_eps)
                 * g_ref[...].astype(jnp.float32)
                 + beta_ref[...].astype(jnp.float32))
        o_ref[...] = h.astype(o_ref.dtype)


def dense(x, w, b, *, activation=None, residual=None, ln_g=None, ln_b=None,
          ln_eps=1e-12, out_dtype=jnp.bfloat16, tm=1024, tn=512, tk=1024):
    # x: [M, K] bf16, w: [K, N] bf16, b: [1, N] f32; residual/ln_*: [M,N]/[1,N].
    M, K = x.shape
    N = w.shape[1]
    fuse_ln = residual is not None
    assert not (fuse_ln and activation), "activation + fused LN not combined here"
    tm, tn, tk = _fit_tiles(M, N, K, tm, tn, tk, fix_tn=fuse_ln)
    grid = (M // tm, N // tn, K // tk)

    in_specs = [
        pl.BlockSpec((tm, tk), lambda i, j, k: (i, k)),
        pl.BlockSpec((tk, tn), lambda i, j, k: (k, j)),
        pl.BlockSpec((1, tn), lambda i, j, k: (0, j)),
    ]
    args = [x, w, b]
    if fuse_ln:
        in_specs += [
            pl.BlockSpec((tm, tn), lambda i, j, k: (i, j)),
            pl.BlockSpec((1, tn), lambda i, j, k: (0, j)),
            pl.BlockSpec((1, tn), lambda i, j, k: (0, j)),
        ]
        args += [residual, ln_g, ln_b]

    kern = functools.partial(_dense_kernel, activation=activation,
                             fuse_ln=fuse_ln, ln_eps=ln_eps)
    return pl.pallas_call(
        kern,
        out_shape=jax.ShapeDtypeStruct((M, N), out_dtype),
        grid=grid,
        in_specs=in_specs,
        out_specs=pl.BlockSpec((tm, tn), lambda i, j, k: (i, j)),
        scratch_shapes=[pltpu.VMEM((tm, tn), jnp.float32)],
        compiler_params=pltpu.CompilerParams(
            dimension_semantics=("parallel", "parallel", "arbitrary"),
            vmem_limit_bytes=VMEM_LIMIT),
    )(*args)


# ----------------------------------------------------------------------------
# Kernel: standalone layernorm over the last axis (embedding LN only;
#         per-layer LNs are fused into the dense epilogues above)
# ----------------------------------------------------------------------------
def _ln_kernel(x_ref, g_ref, b_ref, o_ref, *, eps):
    x = x_ref[...].astype(jnp.float32)
    mu = jnp.mean(x, axis=-1, keepdims=True)
    xc = x - mu
    var = jnp.mean(xc * xc, axis=-1, keepdims=True)
    y = (xc * jax.lax.rsqrt(var + eps) * g_ref[...].astype(jnp.float32)
         + b_ref[...].astype(jnp.float32))
    o_ref[...] = y.astype(o_ref.dtype)


def layernorm(x, g, b, *, eps=1e-12, out_dtype=jnp.bfloat16, tm=1024):
    M, H = x.shape
    tm = _pick_tile(M, tm, 8)
    row_spec = pl.BlockSpec((tm, H), lambda i: (i, 0))
    vec_spec = pl.BlockSpec((1, H), lambda i: (0, 0))
    return pl.pallas_call(
        functools.partial(_ln_kernel, eps=eps),
        out_shape=jax.ShapeDtypeStruct((M, H), out_dtype),
        grid=(M // tm,),
        in_specs=[row_spec, vec_spec, vec_spec],
        out_specs=row_spec,
        compiler_params=pltpu.CompilerParams(
            dimension_semantics=("parallel",), vmem_limit_bytes=VMEM_LIMIT),
    )(x, g, b)


# ----------------------------------------------------------------------------
# Kernel: flash attention on the [B, S, H] layout (all heads per program,
#         online softmax over kv tiles, padding bias broadcast in-kernel)
# ----------------------------------------------------------------------------
def _flash_attn_kernel(q_ref, k_ref, v_ref, bias_ref, o_ref,
                       m_sc, l_sc, acc_sc, *, nH, dH):
    ki = pl.program_id(2)

    @pl.when(ki == 0)
    def _():
        m_sc[...] = jnp.full_like(m_sc, -jnp.inf)
        l_sc[...] = jnp.zeros_like(l_sc)
        acc_sc[...] = jnp.zeros_like(acc_sc)

    q = q_ref[...]                               # [tq, H] bf16; 1/sqrt(dH) pre-folded into W_q
    k = k_ref[...]                               # [tkv, H]
    v = v_ref[...]
    bias = bias_ref[...].astype(jnp.float32)     # [1, tkv] additive padding bias

    for h in range(nH):                          # static unroll over heads
        lo, hi = h * dH, (h + 1) * dH
        s = jax.lax.dot_general(q[:, lo:hi], k[:, lo:hi],
                                (((1,), (1,)), ((), ())),
                                preferred_element_type=jnp.float32)   # [tq, tkv]
        s = s + bias
        m_prev = m_sc[h]
        m_new = jnp.maximum(m_prev, jnp.max(s, axis=-1, keepdims=True))
        alpha = jnp.exp(m_prev - m_new)
        p = jnp.exp(s - m_new)
        l_sc[h] = alpha * l_sc[h] + jnp.sum(p, axis=-1, keepdims=True)
        acc_sc[h] = alpha * acc_sc[h] + jnp.dot(
            p.astype(v.dtype), v[:, lo:hi], preferred_element_type=jnp.float32)
        m_sc[h] = m_new

    @pl.when(ki == pl.num_programs(2) - 1)
    def _():
        outs = [acc_sc[h] * pl.reciprocal(l_sc[h], approx=False)
                for h in range(nH)]
        o_ref[...] = jnp.concatenate(outs, axis=-1).astype(o_ref.dtype)


def flash_attention(q, k, v, bias, *, nH, tq=512, tkv=1024):
    # q/k/v: [B, S, H] bf16 (head-interleaved last dim); bias: [B, 1, S] f32.
    B, S, H = q.shape
    dH = H // nH
    tq = _pick_tile(S, tq, 8)
    tkv = _pick_tile(S, tkv, 128)     # tkv == S for S <= 1024 -> single KV step
    grid = (B, S // tq, S // tkv)
    kern = functools.partial(_flash_attn_kernel, nH=nH, dH=dH)
    return pl.pallas_call(
        kern,
        out_shape=jax.ShapeDtypeStruct((B, S, H), q.dtype),
        grid=grid,
        in_specs=[
            pl.BlockSpec((None, tq, H), lambda b, qi, ki: (b, qi, 0)),
            pl.BlockSpec((None, tkv, H), lambda b, qi, ki: (b, ki, 0)),
            pl.BlockSpec((None, tkv, H), lambda b, qi, ki: (b, ki, 0)),
            pl.BlockSpec((None, 1, tkv), lambda b, qi, ki: (b, 0, ki)),
        ],
        out_specs=pl.BlockSpec((None, tq, H), lambda b, qi, ki: (b, qi, 0)),
        scratch_shapes=[
            pltpu.VMEM((nH, tq, 1), jnp.float32),    # per-head running max
            pltpu.VMEM((nH, tq, 1), jnp.float32),    # per-head running denominator
            pltpu.VMEM((nH, tq, dH), jnp.float32),   # per-head running numerator
        ],
        compiler_params=pltpu.CompilerParams(
            dimension_semantics=("parallel", "parallel", "arbitrary"),
            vmem_limit_bytes=VMEM_LIMIT),
    )(q, k, v, bias)


# ----------------------------------------------------------------------------
# Kernel: masked mean pooling, tiled over (B parallel, S reduction)
# (matches SBertEmbedding.mean_pooling semantics, incl. the 1e-9 clamp)
# ----------------------------------------------------------------------------
def _mean_pool_kernel(x_ref, m_ref, o_ref, sum_sc, cnt_sc):
    si = pl.program_id(1)

    @pl.when(si == 0)
    def _():
        sum_sc[...] = jnp.zeros_like(sum_sc)
        cnt_sc[...] = jnp.zeros_like(cnt_sc)

    x = x_ref[...].astype(jnp.float32)          # [tb, ts, H]
    m = m_ref[...].astype(jnp.float32)          # [tb, ts, 1]
    sum_sc[...] += jnp.sum(x * m, axis=1)       # VPU masked sum -> [tb, H]
    cnt_sc[...] += jnp.sum(m, axis=1)           # [tb, 1]

    @pl.when(si == pl.num_programs(1) - 1)
    def _():
        o_ref[...] = (sum_sc[...] /
                      jnp.maximum(cnt_sc[...], 1e-9)).astype(o_ref.dtype)


def mean_pool(token_embeddings, attention_mask, *, tb=8, ts=512):
    # token_embeddings: [B, S, H], attention_mask: [B, S] (0/1) -> [B, H] f32.
    B, S, H = token_embeddings.shape
    tb = _pick_tile(B, tb, 8)
    ts = _pick_tile(S, ts, 8)
    m = attention_mask.astype(jnp.float32).reshape(B, S, 1)
    return pl.pallas_call(
        _mean_pool_kernel,
        out_shape=jax.ShapeDtypeStruct((B, H), jnp.float32),
        grid=(B // tb, S // ts),
        in_specs=[pl.BlockSpec((tb, ts, H), lambda bi, si: (bi, si, 0)),
                  pl.BlockSpec((tb, ts, 1), lambda bi, si: (bi, si, 0))],
        out_specs=pl.BlockSpec((tb, H), lambda bi, si: (bi, 0)),
        scratch_shapes=[pltpu.VMEM((tb, H), jnp.float32),
                        pltpu.VMEM((tb, 1), jnp.float32)],
        compiler_params=pltpu.CompilerParams(
            dimension_semantics=("parallel", "arbitrary"),
            vmem_limit_bytes=VMEM_LIMIT),
    )(token_embeddings, m)


# ----------------------------------------------------------------------------
# Synthetic BERT encoder parameters (deterministic), bf16 matmul weights
# ----------------------------------------------------------------------------
def init_params(key, vocab, max_pos, H, nH, ffn, n_layers):
    dH = H // nH

    def nrm(k, shape, scale=0.02):
        return (scale * jax.random.normal(k, shape, dtype=jnp.float32)
                ).astype(jnp.bfloat16)

    keys = iter(jax.random.split(key, 4 + n_layers * 8))
    params = {
        "word_emb": 0.02 * jax.random.normal(next(keys), (vocab, H), jnp.float32),
        "pos_emb": 0.02 * jax.random.normal(next(keys), (max_pos, H), jnp.float32),
        "type_emb": 0.02 * jax.random.normal(next(keys), (2, H), jnp.float32),
        "emb_ln_g": jnp.ones((1, H), jnp.float32),
        "emb_ln_b": jnp.zeros((1, H), jnp.float32),
        "layers": [],
    }
    for _ in range(n_layers):
        lp = {
            # 1/sqrt(dH) attention scale folded into the Q projection at init.
            "wq": nrm(next(keys), (H, H), 0.02 / (dH ** 0.5)),
            "bq": jnp.zeros((1, H), jnp.float32),
            "wk": nrm(next(keys), (H, H)), "bk": jnp.zeros((1, H), jnp.float32),
            "wv": nrm(next(keys), (H, H)), "bv": jnp.zeros((1, H), jnp.float32),
            "wo": nrm(next(keys), (H, H)), "bo": jnp.zeros((1, H), jnp.float32),
            "ln1_g": jnp.ones((1, H), jnp.float32), "ln1_b": jnp.zeros((1, H), jnp.float32),
            "w1": nrm(next(keys), (H, ffn)), "b1": jnp.zeros((1, ffn), jnp.float32),
            "w2": nrm(next(keys), (ffn, H)), "b2": jnp.zeros((1, H), jnp.float32),
            "ln2_g": jnp.ones((1, H), jnp.float32), "ln2_b": jnp.zeros((1, H), jnp.float32),
        }
        params["layers"].append(lp)
    return params


# ----------------------------------------------------------------------------
# Full forward (SBertEmbedding.forward semantics, pooling='mean')
# ----------------------------------------------------------------------------
def sbert_embedding_forward(params, input_ids, attention_mask, *, nH):
    # TODO(synk): HF tokenizer (string -> input_ids/attention_mask) has no Pallas
    # equivalent; the kernels consume already-tokenized ids + mask.
    B, S = input_ids.shape
    H = params["word_emb"].shape[1]

    # Embedding gathers (XLA glue, token-type 0 only) + layernorm kernel -> bf16.
    x = (params["word_emb"][input_ids]
         + params["pos_emb"][:S][None, :, :]
         + params["type_emb"][0][None, None, :])
    h = layernorm(x.reshape(B * S, H), params["emb_ln_g"], params["emb_ln_b"])

    # Additive attention bias kept un-broadcast as [B, 1, S]; expanded in-kernel
    # (no [B, nH, S, S] tensor in HBM).  f32 so exp() stays well-behaved.
    mask_f = attention_mask.astype(jnp.float32)
    bias = ((1.0 - mask_f) * -1e9).reshape(B, 1, S)

    for lp in params["layers"]:
        # Separate Q/K/V projections keep the head-interleaved [B, S, H] layout,
        # so no head split/merge transposes ever hit HBM (reshapes below are free).
        q = dense(h, lp["wq"], lp["bq"]).reshape(B, S, H)
        k = dense(h, lp["wk"], lp["bk"]).reshape(B, S, H)
        v = dense(h, lp["wv"], lp["bv"]).reshape(B, S, H)

        ctx = flash_attention(q, k, v, bias, nH=nH).reshape(B * S, H)

        # wo projection with fused (+residual, LayerNorm) epilogue.
        x1 = dense(ctx, lp["wo"], lp["bo"],
                   residual=h, ln_g=lp["ln1_g"], ln_b=lp["ln1_b"])
        ffn_h = dense(x1, lp["w1"], lp["b1"], activation="gelu")
        # w2 projection with fused (+residual, LayerNorm) epilogue.
        h = dense(ffn_h, lp["w2"], lp["b2"],
                  residual=x1, ln_g=lp["ln2_g"], ln_b=lp["ln2_b"])

    # pooling == 'mean': tiled masked mean pooling kernel -> [B, H] f32.
    return mean_pool(h.reshape(B, S, H), attention_mask)


# ----------------------------------------------------------------------------
# Main
# ----------------------------------------------------------------------------
if __name__ == "__main__":
    B, S, H, nH, FFN, LAYERS = 2, 8, 32, 2, 64, 2
    VOCAB, MAX_POS = 100, 16

    key = jax.random.PRNGKey(0)
    k_param, k_ids = jax.random.split(key)
    params = init_params(k_param, VOCAB, MAX_POS, H, nH, FFN, LAYERS)

    input_ids = jax.random.randint(k_ids, (B, S), 0, VOCAB, dtype=jnp.int32)
    # Second sequence is padded after 5 tokens (exercises bias + masked pooling).
    attention_mask = jnp.array(
        [[1, 1, 1, 1, 1, 1, 1, 1],
         [1, 1, 1, 1, 1, 0, 0, 0]], dtype=jnp.int32)

    fwd = jax.jit(functools.partial(sbert_embedding_forward, nH=nH))
    emb = fwd(params, input_ids, attention_mask)
    jax.block_until_ready(emb)
    assert emb.shape == (B, H) and emb.dtype == jnp.float32
    print("KERNEL_OK")
</pallas_src>

<mosaic_0001>
module attributes {stable_mosaic.version = 11 : i64} {
  func.func @_flash_attn_kernel(%arg0: i32, %arg1: i32, %arg2: i32, %arg3: memref<1x8x32xbf16, #tpu.memory_space<vmem>>, %arg4: memref<1x8x32xbf16, #tpu.memory_space<vmem>>, %arg5: memref<1x8x32xbf16, #tpu.memory_space<vmem>>, %arg6: memref<1x1x8xf32, #tpu.memory_space<vmem>>, %arg7: memref<1x8x32xbf16, #tpu.memory_space<vmem>>, %arg8: memref<2x8x1xf32, #tpu.memory_space<vmem>>, %arg9: memref<2x8x1xf32, #tpu.memory_space<vmem>>, %arg10: memref<2x8x16xf32, #tpu.memory_space<vmem>>) attributes {dimension_semantics = [#tpu.dimension_semantics<parallel>, #tpu.dimension_semantics<parallel>, #tpu.dimension_semantics<arbitrary>], iteration_bounds = array<i64: 2, 1, 1>, scalar_prefetch = 0 : i64, scratch_operands = 3 : i64, tpu.core_type = #tpu.core_type<tc>, window_params = [{transform_indices = @transform_0, window_bounds = array<i64: 1, 8, 32>}, {transform_indices = @transform_1, window_bounds = array<i64: 1, 8, 32>}, {transform_indices = @transform_2, window_bounds = array<i64: 1, 8, 32>}, {transform_indices = @transform_3, window_bounds = array<i64: 1, 1, 8>}, {transform_indices = @transform_4, window_bounds = array<i64: 1, 8, 32>}]} {
    %c0_i32 = arith.constant 0 : i32
    %0 = arith.cmpi eq, %arg2, %c0_i32 : i32
    %1 = arith.extui %0 : i1 to i32
    %c0_i32_0 = arith.constant 0 : i32
    %2 = arith.cmpi ne, %1, %c0_i32_0 : i32
    scf.if %2 {
      %cst_56 = arith.constant 0xFF800000 : f32
      %90 = vector.broadcast %cst_56 : f32 to vector<2x8x1xf32>
      %c0_57 = arith.constant 0 : index
      %c0_58 = arith.constant 0 : index
      %c0_59 = arith.constant 0 : index
      %91 = vector.load %arg8[%c0_57, %c0_58, %c0_59] : memref<2x8x1xf32, #tpu.memory_space<vmem>>, vector<2x8x1xf32>
      tpu.vector_store %arg8[%c0_57, %c0_58, %c0_59], %90 {strides = array<i32>} : memref<2x8x1xf32, #tpu.memory_space<vmem>>, vector<2x8x1xf32>,
      %cst_60 = arith.constant 0.000000e+00 : f32
      %92 = vector.broadcast %cst_60 : f32 to vector<2x8x1xf32>
      %c0_61 = arith.constant 0 : index
      %c0_62 = arith.constant 0 : index
      %c0_63 = arith.constant 0 : index
      %93 = vector.load %arg9[%c0_61, %c0_62, %c0_63] : memref<2x8x1xf32, #tpu.memory_space<vmem>>, vector<2x8x1xf32>
      tpu.vector_store %arg9[%c0_61, %c0_62, %c0_63], %92 {strides = array<i32>} : memref<2x8x1xf32, #tpu.memory_space<vmem>>, vector<2x8x1xf32>,
      %cst_64 = arith.constant 0.000000e+00 : f32
      %94 = vector.broadcast %cst_64 : f32 to vector<2x8x16xf32>
      %c0_65 = arith.constant 0 : index
      %c0_66 = arith.constant 0 : index
      %c0_67 = arith.constant 0 : index
      %95 = vector.load %arg10[%c0_65, %c0_66, %c0_67] : memref<2x8x16xf32, #tpu.memory_space<vmem>>, vector<2x8x16xf32>
      tpu.vector_store %arg10[%c0_65, %c0_66, %c0_67], %94 {strides = array<i32>} : memref<2x8x16xf32, #tpu.memory_space<vmem>>, vector<2x8x16xf32>,
    } else {
    }
    %c0 = arith.constant 0 : index
    %c0_1 = arith.constant 0 : index
    %c0_2 = arith.constant 0 : index
    %3 = vector.load %arg3[%c0, %c0_1, %c0_2] : memref<1x8x32xbf16, #tpu.memory_space<vmem>>, vector<1x8x32xbf16>
    %4 = vector.shape_cast %3 : vector<1x8x32xbf16> to vector<8x32xbf16>
    %c0_3 = arith.constant 0 : index
    %c0_4 = arith.constant 0 : index
    %c0_5 = arith.constant 0 : index
    %5 = vector.load %arg4[%c0_3, %c0_4, %c0_5] : memref<1x8x32xbf16, #tpu.memory_space<vmem>>, vector<1x8x32xbf16>
    %6 = vector.shape_cast %5 : vector<1x8x32xbf16> to vector<8x32xbf16>
    %c0_6 = arith.constant 0 : index
    %c0_7 = arith.constant 0 : index
    %c0_8 = arith.constant 0 : index
    %7 = vector.load %arg5[%c0_6, %c0_7, %c0_8] : memref<1x8x32xbf16, #tpu.memory_space<vmem>>, vector<1x8x32xbf16>
    %8 = vector.shape_cast %7 : vector<1x8x32xbf16> to vector<8x32xbf16>
    %c0_9 = arith.constant 0 : index
    %c0_10 = arith.constant 0 : index
    %c0_11 = arith.constant 0 : index
    %9 = vector.load %arg6[%c0_9, %c0_10, %c0_11] : memref<1x1x8xf32, #tpu.memory_space<vmem>>, vector<1x1x8xf32>
    %10 = vector.shape_cast %9 : vector<1x1x8xf32> to vector<1x8xf32>
    %11 = vector.extract_strided_slice %4 {offsets = [0, 0], sizes = [8, 16], strides = [1, 1]} : vector<8x32xbf16> to vector<8x16xbf16>
    %12 = vector.extract_strided_slice %6 {offsets = [0, 0], sizes = [8, 16], strides = [1, 1]} : vector<8x32xbf16> to vector<8x16xbf16>
    %cst = arith.constant dense<0.000000e+00> : vector<8x8xf32>
    %13 = tpu.matmul %11, %12, %cst {dimension_numbers = #tpu.dot_dimension_numbers<[1], [1], [0], [0], [0, 0, 1, 0], [], []>} : vector<8x16xbf16>, vector<8x16xbf16>, vector<8x8xf32> -> vector<8x8xf32>
    %14 = vector.broadcast %10 : vector<1x8xf32> to vector<8x8xf32>
    %15 = arith.addf %13, %14 : vector<8x8xf32>
    %c0_12 = arith.constant 0 : index
    %c0_13 = arith.constant 0 : index
    %c0_14 = arith.constant 0 : index
    %16 = vector.load %arg8[%c0_12, %c0_13, %c0_14] : memref<2x8x1xf32, #tpu.memory_space<vmem>>, vector<1x8x1xf32>
    %17 = vector.shape_cast %16 : vector<1x8x1xf32> to vector<8x1xf32>
    %cst_15 = arith.constant dense<0xFF800000> : vector<8xf32>
    %18 = vector.multi_reduction <maximumf>, %15, %cst_15 [1] : vector<8x8xf32> to vector<8xf32>
    %19 = vector.shape_cast %18 : vector<8xf32> to vector<8x1xf32>
    %20 = arith.maximumf %17, %19 : vector<8x1xf32>
    %21 = arith.subf %17, %20 : vector<8x1xf32>
    %22 = math.exp %21 : vector<8x1xf32>
    %23 = vector.broadcast %20 : vector<8x1xf32> to vector<8x8xf32>
    %24 = arith.subf %15, %23 : vector<8x8xf32>
    %25 = math.exp %24 : vector<8x8xf32>
    %c0_16 = arith.constant 0 : index
    %c0_17 = arith.constant 0 : index
    %c0_18 = arith.constant 0 : index
    %26 = vector.load %arg9[%c0_16, %c0_17, %c0_18] : memref<2x8x1xf32, #tpu.memory_space<vmem>>, vector<1x8x1xf32>
    %27 = vector.shape_cast %26 : vector<1x8x1xf32> to vector<8x1xf32>
    %28 = arith.mulf %22, %27 : vector<8x1xf32>
    %cst_19 = arith.constant dense<0.000000e+00> : vector<8xf32>
    %29 = vector.multi_reduction <add>, %25, %cst_19 [1] : vector<8x8xf32> to vector<8xf32>
    %30 = vector.shape_cast %29 : vector<8xf32> to vector<8x1xf32>
    %31 = arith.addf %28, %30 : vector<8x1xf32>
    %c0_20 = arith.constant 0 : index
    %c0_21 = arith.constant 0 : index
    %c0_22 = arith.constant 0 : index
    %32 = vector.load %arg9[%c0_20, %c0_21, %c0_22] : memref<2x8x1xf32, #tpu.memory_space<vmem>>, vector<1x8x1xf32>
    %33 = vector.shape_cast %32 : vector<1x8x1xf32> to vector<8x1xf32>
    %34 = vector.shape_cast %31 : vector<8x1xf32> to vector<1x8x1xf32>
    tpu.vector_store %arg9[%c0_20, %c0_21, %c0_22], %34 {strides = array<i32>} : memref<2x8x1xf32, #tpu.memory_space<vmem>>, vector<1x8x1xf32>,
    %c0_23 = arith.constant 0 : index
    %c0_24 = arith.constant 0 : index
    %c0_25 = arith.constant 0 : index
    %35 = vector.load %arg10[%c0_23, %c0_24, %c0_25] : memref<2x8x16xf32, #tpu.memory_space<vmem>>, vector<1x8x16xf32>
    %36 = vector.shape_cast %35 : vector<1x8x16xf32> to vector<8x16xf32>
    %37 = vector.broadcast %22 : vector<8x1xf32> to vector<8x16xf32>
    %38 = arith.mulf %37, %36 : vector<8x16xf32>
    %39 = arith.truncf %25 : vector<8x8xf32> to vector<8x8xbf16>
    %40 = vector.extract_strided_slice %8 {offsets = [0, 0], sizes = [8, 16], strides = [1, 1]} : vector<8x32xbf16> to vector<8x16xbf16>
    %cst_26 = arith.constant dense<0.000000e+00> : vector<8x16xf32>
    %41 = tpu.matmul %39, %40, %cst_26 {dimension_numbers = #tpu.dot_dimension_numbers<[1], [0], [0], [1], [0, 0, 1, 1], [], []>} : vector<8x8xbf16>, vector<8x16xbf16>, vector<8x16xf32> -> vector<8x16xf32>
    %42 = arith.addf %38, %41 : vector<8x16xf32>
    %c0_27 = arith.constant 0 : index
    %c0_28 = arith.constant 0 : index
    %c0_29 = arith.constant 0 : index
    %43 = vector.load %arg10[%c0_27, %c0_28, %c0_29] : memref<2x8x16xf32, #tpu.memory_space<vmem>>, vector<1x8x16xf32>
    %44 = vector.shape_cast %43 : vector<1x8x16xf32> to vector<8x16xf32>
    %45 = vector.shape_cast %42 : vector<8x16xf32> to vector<1x8x16xf32>
    tpu.vector_store %arg10[%c0_27, %c0_28, %c0_29], %45 {strides = array<i32>} : memref<2x8x16xf32, #tpu.memory_space<vmem>>, vector<1x8x16xf32>,
    %c0_30 = arith.constant 0 : index
    %c0_31 = arith.constant 0 : index
    %c0_32 = arith.constant 0 : index
    %46 = vector.load %arg8[%c0_30, %c0_31, %c0_32] : memref<2x8x1xf32, #tpu.memory_space<vmem>>, vector<1x8x1xf32>
    %47 = vector.shape_cast %46 : vector<1x8x1xf32> to vector<8x1xf32>
    %48 = vector.shape_cast %20 : vector<8x1xf32> to vector<1x8x1xf32>
    tpu.vector_store %arg8[%c0_30, %c0_31, %c0_32], %48 {strides = array<i32>} : memref<2x8x1xf32, #tpu.memory_space<vmem>>, vector<1x8x1xf32>,
    %49 = vector.extract_strided_slice %4 {offsets = [0, 16], sizes = [8, 16], strides = [1, 1]} : vector<8x32xbf16> to vector<8x16xbf16>
    %50 = vector.extract_strided_slice %6 {offsets = [0, 16], sizes = [8, 16], strides = [1, 1]} : vector<8x32xbf16> to vector<8x16xbf16>
    %cst_33 = arith.constant dense<0.000000e+00> : vector<8x8xf32>
    %51 = tpu.matmul %49, %50, %cst_33 {dimension_numbers = #tpu.dot_dimension_numbers<[1], [1], [0], [0], [0, 0, 1, 0], [], []>} : vector<8x16xbf16>, vector<8x16xbf16>, vector<8x8xf32> -> vector<8x8xf32>
    %52 = vector.broadcast %10 : vector<1x8xf32> to vector<8x8xf32>
    %53 = arith.addf %51, %52 : vector<8x8xf32>
    %c1 = arith.constant 1 : index
    %c0_34 = arith.constant 0 : index
    %c0_35 = arith.constant 0 : index
    %54 = vector.load %arg8[%c1, %c0_34, %c0_35] : memref<2x8x1xf32, #tpu.memory_space<vmem>>, vector<1x8x1xf32>
    %55 = vector.shape_cast %54 : vector<1x8x1xf32> to vector<8x1xf32>
    %cst_36 = arith.constant dense<0xFF800000> : vector<8xf32>
    %56 = vector.multi_reduction <maximumf>, %53, %cst_36 [1] : vector<8x8xf32> to vector<8xf32>
    %57 = vector.shape_cast %56 : vector<8xf32> to vector<8x1xf32>
    %58 = arith.maximumf %55, %57 : vector<8x1xf32>
    %59 = arith.subf %55, %58 : vector<8x1xf32>
    %60 = math.exp %59 : vector<8x1xf32>
    %61 = vector.broadcast %58 : vector<8x1xf32> to vector<8x8xf32>
    %62 = arith.subf %53, %61 : vector<8x8xf32>
    %63 = math.exp %62 : vector<8x8xf32>
    %c1_37 = arith.constant 1 : index
    %c0_38 = arith.constant 0 : index
    %c0_39 = arith.constant 0 : index
    %64 = vector.load %arg9[%c1_37, %c0_38, %c0_39] : memref<2x8x1xf32, #tpu.memory_space<vmem>>, vector<1x8x1xf32>
    %65 = vector.shape_cast %64 : vector<1x8x1xf32> to vector<8x1xf32>
    %66 = arith.mulf %60, %65 : vector<8x1xf32>
    %cst_40 = arith.constant dense<0.000000e+00> : vector<8xf32>
    %67 = vector.multi_reduction <add>, %63, %cst_40 [1] : vector<8x8xf32> to vector<8xf32>
    %68 = vector.shape_cast %67 : vector<8xf32> to vector<8x1xf32>
    %69 = arith.addf %66, %68 : vector<8x1xf32>
    %c1_41 = arith.constant 1 : index
    %c0_42 = arith.constant 0 : index
    %c0_43 = arith.constant 0 : index
    %70 = vector.load %arg9[%c1_41, %c0_42, %c0_43] : memref<2x8x1xf32, #tpu.memory_space<vmem>>, vector<1x8x1xf32>
    %71 = vector.shape_cast %70 : vector<1x8x1xf32> to vector<8x1xf32>
    %72 = vector.shape_cast %69 : vector<8x1xf32> to vector<1x8x1xf32>
    tpu.vector_store %arg9[%c1_41, %c0_42, %c0_43], %72 {strides = array<i32>} : memref<2x8x1xf32, #tpu.memory_space<vmem>>, vector<1x8x1xf32>,
    %c1_44 = arith.constant 1 : index
    %c0_45 = arith.constant 0 : index
    %c0_46 = arith.constant 0 : index
    %73 = vector.load %arg10[%c1_44, %c0_45, %c0_46] : memref<2x8x16xf32, #tpu.memory_space<vmem>>, vector<1x8x16xf32>
    %74 = vector.shape_cast %73 : vector<1x8x16xf32> to vector<8x16xf32>
    %75 = vector.broadcast %60 : vector<8x1xf32> to vector<8x16xf32>
    %76 = arith.mulf %75, %74 : vector<8x16xf32>
    %77 = arith.truncf %63 : vector<8x8xf32> to vector<8x8xbf16>
    %78 = vector.extract_strided_slice %8 {offsets = [0, 16], sizes = [8, 16], strides = [1, 1]} : vector<8x32xbf16> to vector<8x16xbf16>
    %cst_47 = arith.constant dense<0.000000e+00> : vector<8x16xf32>
    %79 = tpu.matmul %77, %78, %cst_47 {dimension_numbers = #tpu.dot_dimension_numbers<[1], [0], [0], [1], [0, 0, 1, 1], [], []>} : vector<8x8xbf16>, vector<8x16xbf16>, vector<8x16xf32> -> vector<8x16xf32>
    %80 = arith.addf %76, %79 : vector<8x16xf32>
    %c1_48 = arith.constant 1 : index
    %c0_49 = arith.constant 0 : index
    %c0_50 = arith.constant 0 : index
    %81 = vector.load %arg10[%c1_48, %c0_49, %c0_50] : memref<2x8x16xf32, #tpu.memory_space<vmem>>, vector<1x8x16xf32>
    %82 = vector.shape_cast %81 : vector<1x8x16xf32> to vector<8x16xf32>
    %83 = vector.shape_cast %80 : vector<8x16xf32> to vector<1x8x16xf32>
    tpu.vector_store %arg10[%c1_48, %c0_49, %c0_50], %83 {strides = array<i32>} : memref<2x8x16xf32, #tpu.memory_space<vmem>>, vector<1x8x16xf32>,
    %c1_51 = arith.constant 1 : index
    %c0_52 = arith.constant 0 : index
    %c0_53 = arith.constant 0 : index
    %84 = vector.load %arg8[%c1_51, %c0_52, %c0_53] : memref<2x8x1xf32, #tpu.memory_space<vmem>>, vector<1x8x1xf32>
    %85 = vector.shape_cast %84 : vector<1x8x1xf32> to vector<8x1xf32>
    %86 = vector.shape_cast %58 : vector<8x1xf32> to vector<1x8x1xf32>
    tpu.vector_store %arg8[%c1_51, %c0_52, %c0_53], %86 {strides = array<i32>} : memref<2x8x1xf32, #tpu.memory_space<vmem>>, vector<1x8x1xf32>,
    %c0_i32_54 = arith.constant 0 : i32
    %87 = arith.cmpi eq, %arg2, %c0_i32_54 : i32
    %88 = arith.extui %87 : i1 to i32
    %c0_i32_55 = arith.constant 0 : i32
    %89 = arith.cmpi ne, %88, %c0_i32_55 : i32
    scf.if %89 {
      %c0_56 = arith.constant 0 : index
      %c0_57 = arith.constant 0 : index
      %c0_58 = arith.constant 0 : index
      %90 = vector.load %arg10[%c0_56, %c0_57, %c0_58] : memref<2x8x16xf32, #tpu.memory_space<vmem>>, vector<1x8x16xf32>
      %91 = vector.shape_cast %90 : vector<1x8x16xf32> to vector<8x16xf32>
      %c0_59 = arith.constant 0 : index
      %c0_60 = arith.constant 0 : index
      %c0_61 = arith.constant 0 : index
      %92 = vector.load %arg9[%c0_59, %c0_60, %c0_61] : memref<2x8x1xf32, #tpu.memory_space<vmem>>, vector<1x8x1xf32>
      %93 = vector.shape_cast %92 : vector<1x8x1xf32> to vector<8x1xf32>
      %94 = tpu.reciprocal %93 : vector<8x1xf32> -> vector<8x1xf32>
      %95 = vector.broadcast %94 : vector<8x1xf32> to vector<8x16xf32>
      %96 = arith.mulf %91, %95 : vector<8x16xf32>
      %c1_62 = arith.constant 1 : index
      %c0_63 = arith.constant 0 : index
      %c0_64 = arith.constant 0 : index
      %97 = vector.load %arg10[%c1_62, %c0_63, %c0_64] : memref<2x8x16xf32, #tpu.memory_space<vmem>>, vector<1x8x16xf32>
      %98 = vector.shape_cast %97 : vector<1x8x16xf32> to vector<8x16xf32>
      %c1_65 = arith.constant 1 : index
      %c0_66 = arith.constant 0 : index
      %c0_67 = arith.constant 0 : index
      %99 = vector.load %arg9[%c1_65, %c0_66, %c0_67] : memref<2x8x1xf32, #tpu.memory_space<vmem>>, vector<1x8x1xf32>
      %100 = vector.shape_cast %99 : vector<1x8x1xf32> to vector<8x1xf32>
      %101 = tpu.reciprocal %100 : vector<8x1xf32> -> vector<8x1xf32>
      %102 = vector.broadcast %101 : vector<8x1xf32> to vector<8x16xf32>
      %103 = arith.mulf %98, %102 : vector<8x16xf32>
      %104 = tpu.concatenate %96, %103 in 1 : vector<8x16xf32>, vector<8x16xf32> -> vector<8x32xf32>
      %105 = arith.truncf %104 : vector<8x32xf32> to vector<8x32xbf16>
      %c0_68 = arith.constant 0 : index
      %c0_69 = arith.constant 0 : index
      %c0_70 = arith.constant 0 : index
      %106 = vector.load %arg7[%c0_68, %c0_69, %c0_70] : memref<1x8x32xbf16, #tpu.memory_space<vmem>>, vector<1x8x32xbf16>
      %107 = vector.shape_cast %106 : vector<1x8x32xbf16> to vector<8x32xbf16>
      %108 = vector.shape_cast %105 : vector<8x32xbf16> to vector<1x8x32xbf16>
      tpu.vector_store %arg7[%c0_68, %c0_69, %c0_70], %108 {strides = array<i32>} : memref<1x8x32xbf16, #tpu.memory_space<vmem>>, vector<1x8x32xbf16>,
    } else {
    }
    return
  }
  func.func @transform_0(%arg0: i32, %arg1: i32, %arg2: i32) -> (i32, i32, i32) {
    %c0_i32 = arith.constant 0 : i32
    %c0_i32_0 = arith.constant 0 : i32
    return %arg0, %arg1, %c0_i32 : i32, i32, i32
  }
  func.func @transform_1(%arg0: i32, %arg1: i32, %arg2: i32) -> (i32, i32, i32) {
    %c0_i32 = arith.constant 0 : i32
    %c0_i32_0 = arith.constant 0 : i32
    return %arg0, %arg2, %c0_i32 : i32, i32, i32
  }
  func.func @transform_2(%arg0: i32, %arg1: i32, %arg2: i32) -> (i32, i32, i32) {
    %c0_i32 = arith.constant 0 : i32
    %c0_i32_0 = arith.constant 0 : i32
    return %arg0, %arg2, %c0_i32 : i32, i32, i32
  }
  func.func @transform_3(%arg0: i32, %arg1: i32, %arg2: i32) -> (i32, i32, i32) {
    %c0_i32 = arith.constant 0 : i32
    %c0_i32_0 = arith.constant 0 : i32
    return %arg0, %c0_i32, %arg2 : i32, i32, i32
  }
  func.func @transform_4(%arg0: i32, %arg1: i32, %arg2: i32) -> (i32, i32, i32) {
    %c0_i32 = arith.constant 0 : i32
    %c0_i32_0 = arith.constant 0 : i32
    return %arg0, %arg1, %c0_i32 : i32, i32, i32
  }
}

module attributes {stable_mosaic.version = 11 : i64} {
  func.func @_ln_kernel(%arg0: i32, %arg1: memref<16x32xf32, #tpu.memory_space<vmem>>, %arg2: memref<1x32xf32, #tpu.memory_space<vmem>>, %arg3: memref<1x32xf32, #tpu.memory_space<vmem>>, %arg4: memref<16x32xbf16, #tpu.memory_space<vmem>>) attributes {dimension_semantics = [#tpu.dimension_semantics<parallel>], iteration_bounds = array<i64: 1>, scalar_prefetch = 0 : i64, scratch_operands = 0 : i64, tpu.core_type = #tpu.core_type<tc>, window_params = [{transform_indices = @transform_0, window_bounds = array<i64: 16, 32>}, {pipeline_mode = #tpu.pipeline_mode<synchronous>, transform_indices = @transform_1, window_bounds = array<i64: 1, 32>}, {pipeline_mode = #tpu.pipeline_mode<synchronous>, transform_indices = @transform_2, window_bounds = array<i64: 1, 32>}, {transform_indices = @transform_3, window_bounds = array<i64: 16, 32>}]} {
    %c0 = arith.constant 0 : index
    %c0_0 = arith.constant 0 : index
    %0 = vector.load %arg1[%c0, %c0_0] : memref<16x32xf32, #tpu.memory_space<vmem>>, vector<16x32xf32>
    %cst = arith.constant dense<0.000000e+00> : vector<16xf32>
    %1 = vector.multi_reduction <add>, %0, %cst [1] : vector<16x32xf32> to vector<16xf32>
    %2 = vector.shape_cast %1 : vector<16xf32> to vector<16x1xf32>
    %cst_1 = arith.constant 3.200000e+01 : f32
    %3 = vector.broadcast %cst_1 : f32 to vector<16x1xf32>
    %4 = arith.divf %2, %3 : vector<16x1xf32>
    %5 = vector.broadcast %4 : vector<16x1xf32> to vector<16x32xf32>
    %6 = arith.subf %0, %5 : vector<16x32xf32>
    %7 = arith.mulf %6, %6 : vector<16x32xf32>
    %cst_2 = arith.constant dense<0.000000e+00> : vector<16xf32>
    %8 = vector.multi_reduction <add>, %7, %cst_2 [1] : vector<16x32xf32> to vector<16xf32>
    %9 = vector.shape_cast %8 : vector<16xf32> to vector<16x1xf32>
    %cst_3 = arith.constant 3.200000e+01 : f32
    %10 = vector.broadcast %cst_3 : f32 to vector<16x1xf32>
    %11 = arith.divf %9, %10 : vector<16x1xf32>
    %cst_4 = arith.constant 9.99999996E-13 : f32
    %12 = vector.broadcast %cst_4 : f32 to vector<16x1xf32>
    %13 = arith.addf %11, %12 : vector<16x1xf32>
    %14 = math.rsqrt %13 : vector<16x1xf32>
    %15 = vector.broadcast %14 : vector<16x1xf32> to vector<16x32xf32>
    %16 = arith.mulf %6, %15 : vector<16x32xf32>
    %c0_5 = arith.constant 0 : index
    %c0_6 = arith.constant 0 : index
    %17 = vector.load %arg2[%c0_5, %c0_6] : memref<1x32xf32, #tpu.memory_space<vmem>>, vector<1x32xf32>
    %18 = vector.broadcast %17 : vector<1x32xf32> to vector<16x32xf32>
    %19 = arith.mulf %16, %18 : vector<16x32xf32>
    %c0_7 = arith.constant 0 : index
    %c0_8 = arith.constant 0 : index
    %20 = vector.load %arg3[%c0_7, %c0_8] : memref<1x32xf32, #tpu.memory_space<vmem>>, vector<1x32xf32>
    %21 = vector.broadcast %20 : vector<1x32xf32> to vector<16x32xf32>
    %22 = arith.addf %19, %21 : vector<16x32xf32>
    %23 = arith.truncf %22 : vector<16x32xf32> to vector<16x32xbf16>
    %c0_9 = arith.constant 0 : index
    %c0_10 = arith.constant 0 : index
    %24 = vector.load %arg4[%c0_9, %c0_10] : memref<16x32xbf16, #tpu.memory_space<vmem>>, vector<16x32xbf16>
    tpu.vector_store %arg4[%c0_9, %c0_10], %23 {strides = array<i32>} : memref<16x32xbf16, #tpu.memory_space<vmem>>, vector<16x32xbf16>,
    return
  }
  func.func @transform_0(%arg0: i32) -> (i32, i32) {
    %c0_i32 = arith.constant 0 : i32
    %c0_i32_0 = arith.constant 0 : i32
    return %arg0, %c0_i32 : i32, i32
  }
  func.func @transform_1(%arg0: i32) -> (i32, i32) {
    %c0_i32 = arith.constant 0 : i32
    %c0_i32_0 = arith.constant 0 : i32
    %c0_i32_1 = arith.constant 0 : i32
    return %c0_i32, %c0_i32_0 : i32, i32
  }
  func.func @transform_2(%arg0: i32) -> (i32, i32) {
    %c0_i32 = arith.constant 0 : i32
    %c0_i32_0 = arith.constant 0 : i32
    %c0_i32_1 = arith.constant 0 : i32
    return %c0_i32, %c0_i32_0 : i32, i32
  }
  func.func @transform_3(%arg0: i32) -> (i32, i32) {
    %c0_i32 = arith.constant 0 : i32
    %c0_i32_0 = arith.constant 0 : i32
    return %arg0, %c0_i32 : i32, i32
  }
}

module attributes {stable_mosaic.version = 11 : i64} {
  func.func @_dense_kernel(%arg0: i32, %arg1: i32, %arg2: i32, %arg3: memref<16x32xbf16, #tpu.memory_space<vmem>>, %arg4: memref<32x32xbf16, #tpu.memory_space<vmem>>, %arg5: memref<1x32xf32, #tpu.memory_space<vmem>>, %arg6: memref<16x32xbf16, #tpu.memory_space<vmem>>, %arg7: memref<16x32xf32, #tpu.memory_space<vmem>>) attributes {dimension_semantics = [#tpu.dimension_semantics<parallel>, #tpu.dimension_semantics<parallel>, #tpu.dimension_semantics<arbitrary>], iteration_bounds = array<i64: 1, 1, 1>, scalar_prefetch = 0 : i64, scratch_operands = 1 : i64, tpu.core_type = #tpu.core_type<tc>, window_params = [{transform_indices = @transform_0, window_bounds = array<i64: 16, 32>}, {transform_indices = @transform_1, window_bounds = array<i64: 32, 32>}, {transform_indices = @transform_2, window_bounds = array<i64: 1, 32>}, {transform_indices = @transform_3, window_bounds = array<i64: 16, 32>}]} {
    %c0_i32 = arith.constant 0 : i32
    %0 = arith.cmpi eq, %arg2, %c0_i32 : i32
    %1 = arith.extui %0 : i1 to i32
    %c0_i32_0 = arith.constant 0 : i32
    %2 = arith.cmpi ne, %1, %c0_i32_0 : i32
    scf.if %2 {
      %cst_10 = arith.constant 0.000000e+00 : f32
      %12 = vector.broadcast %cst_10 : f32 to vector<16x32xf32>
      %c0_11 = arith.constant 0 : index
      %c0_12 = arith.constant 0 : index
      %13 = vector.load %arg7[%c0_11, %c0_12] : memref<16x32xf32, #tpu.memory_space<vmem>>, vector<16x32xf32>
      tpu.vector_store %arg7[%c0_11, %c0_12], %12 {strides = array<i32>} : memref<16x32xf32, #tpu.memory_space<vmem>>, vector<16x32xf32>,
    } else {
    }
    %c0 = arith.constant 0 : index
    %c0_1 = arith.constant 0 : index
    %3 = vector.load %arg7[%c0, %c0_1] : memref<16x32xf32, #tpu.memory_space<vmem>>, vector<16x32xf32>
    %c0_2 = arith.constant 0 : index
    %c0_3 = arith.constant 0 : index
    %4 = vector.load %arg3[%c0_2, %c0_3] : memref<16x32xbf16, #tpu.memory_space<vmem>>, vector<16x32xbf16>
    %c0_4 = arith.constant 0 : index
    %c0_5 = arith.constant 0 : index
    %5 = vector.load %arg4[%c0_4, %c0_5] : memref<32x32xbf16, #tpu.memory_space<vmem>>, vector<32x32xbf16>
    %cst = arith.constant dense<0.000000e+00> : vector<16x32xf32>
    %6 = tpu.matmul %4, %5, %cst {dimension_numbers = #tpu.dot_dimension_numbers<[1], [0], [0], [1], [0, 0, 1, 1], [], []>} : vector<16x32xbf16>, vector<32x32xbf16>, vector<16x32xf32> -> vector<16x32xf32>
    %7 = arith.addf %3, %6 : vector<16x32xf32>
    %c0_6 = arith.constant 0 : index
    %c0_7 = arith.constant 0 : index
    %8 = vector.load %arg7[%c0_6, %c0_7] : memref<16x32xf32, #tpu.memory_space<vmem>>, vector<16x32xf32>
    tpu.vector_store %arg7[%c0_6, %c0_7], %7 {strides = array<i32>} : memref<16x32xf32, #tpu.memory_space<vmem>>, vector<16x32xf32>,
    %c0_i32_8 = arith.constant 0 : i32
    %9 = arith.cmpi eq, %arg2, %c0_i32_8 : i32
    %10 = arith.extui %9 : i1 to i32
    %c0_i32_9 = arith.constant 0 : i32
    %11 = arith.cmpi ne, %10, %c0_i32_9 : i32
    scf.if %11 {
      %c0_10 = arith.constant 0 : index
      %c0_11 = arith.constant 0 : index
      %12 = vector.load %arg7[%c0_10, %c0_11] : memref<16x32xf32, #tpu.memory_space<vmem>>, vector<16x32xf32>
      %c0_12 = arith.constant 0 : index
      %c0_13 = arith.constant 0 : index
      %13 = vector.load %arg5[%c0_12, %c0_13] : memref<1x32xf32, #tpu.memory_space<vmem>>, vector<1x32xf32>
      %14 = vector.broadcast %13 : vector<1x32xf32> to vector<16x32xf32>
      %15 = arith.addf %12, %14 : vector<16x32xf32>
      %16 = arith.truncf %15 : vector<16x32xf32> to vector<16x32xbf16>
      %c0_14 = arith.constant 0 : index
      %c0_15 = arith.constant 0 : index
      %17 = vector.load %arg6[%c0_14, %c0_15] : memref<16x32xbf16, #tpu.memory_space<vmem>>, vector<16x32xbf16>
      tpu.vector_store %arg6[%c0_14, %c0_15], %16 {strides = array<i32>} : memref<16x32xbf16, #tpu.memory_space<vmem>>, vector<16x32xbf16>,
    } else {
    }
    return
  }
  func.func @transform_0(%arg0: i32, %arg1: i32, %arg2: i32) -> (i32, i32) {
    %c0_i32 = arith.constant 0 : i32
    return %arg0, %arg2 : i32, i32
  }
  func.func @transform_1(%arg0: i32, %arg1: i32, %arg2: i32) -> (i32, i32) {
    %c0_i32 = arith.constant 0 : i32
    return %arg2, %arg1 : i32, i32
  }
  func.func @transform_2(%arg0: i32, %arg1: i32, %arg2: i32) -> (i32, i32) {
    %c0_i32 = arith.constant 0 : i32
    %c0_i32_0 = arith.constant 0 : i32
    return %c0_i32, %arg1 : i32, i32
  }
  func.func @transform_3(%arg0: i32, %arg1: i32, %arg2: i32) -> (i32, i32) {
    %c0_i32 = arith.constant 0 : i32
    return %arg0, %arg1 : i32, i32
  }
}

module attributes {stable_mosaic.version = 11 : i64} {
  func.func @_dense_kernel(%arg0: i32, %arg1: i32, %arg2: i32, %arg3: memref<16x32xbf16, #tpu.memory_space<vmem>>, %arg4: memref<32x32xbf16, #tpu.memory_space<vmem>>, %arg5: memref<1x32xf32, #tpu.memory_space<vmem>>, %arg6: memref<16x32xbf16, #tpu.memory_space<vmem>>, %arg7: memref<1x32xf32, #tpu.memory_space<vmem>>, %arg8: memref<1x32xf32, #tpu.memory_space<vmem>>, %arg9: memref<16x32xbf16, #tpu.memory_space<vmem>>, %arg10: memref<16x32xf32, #tpu.memory_space<vmem>>) attributes {dimension_semantics = [#tpu.dimension_semantics<parallel>, #tpu.dimension_semantics<parallel>, #tpu.dimension_semantics<arbitrary>], iteration_bounds = array<i64: 1, 1, 1>, scalar_prefetch = 0 : i64, scratch_operands = 1 : i64, tpu.core_type = #tpu.core_type<tc>, window_params = [{transform_indices = @transform_0, window_bounds = array<i64: 16, 32>}, {transform_indices = @transform_1, window_bounds = array<i64: 32, 32>}, {transform_indices = @transform_2, window_bounds = array<i64: 1, 32>}, {transform_indices = @transform_3, window_bounds = array<i64: 16, 32>}, {transform_indices = @transform_4, window_bounds = array<i64: 1, 32>}, {transform_indices = @transform_5, window_bounds = array<i64: 1, 32>}, {transform_indices = @transform_6, window_bounds = array<i64: 16, 32>}]} {
    %c0_i32 = arith.constant 0 : i32
    %0 = arith.cmpi eq, %arg2, %c0_i32 : i32
    %1 = arith.extui %0 : i1 to i32
    %c0_i32_0 = arith.constant 0 : i32
    %2 = arith.cmpi ne, %1, %c0_i32_0 : i32
    scf.if %2 {
      %cst_10 = arith.constant 0.000000e+00 : f32
      %12 = vector.broadcast %cst_10 : f32 to vector<16x32xf32>
      %c0_11 = arith.constant 0 : index
      %c0_12 = arith.constant 0 : index
      %13 = vector.load %arg10[%c0_11, %c0_12] : memref<16x32xf32, #tpu.memory_space<vmem>>, vector<16x32xf32>
      tpu.vector_store %arg10[%c0_11, %c0_12], %12 {strides = array<i32>} : memref<16x32xf32, #tpu.memory_space<vmem>>, vector<16x32xf32>,
    } else {
    }
    %c0 = arith.constant 0 : index
    %c0_1 = arith.constant 0 : index
    %3 = vector.load %arg10[%c0, %c0_1] : memref<16x32xf32, #tpu.memory_space<vmem>>, vector<16x32xf32>
    %c0_2 = arith.constant 0 : index
    %c0_3 = arith.constant 0 : index
    %4 = vector.load %arg3[%c0_2, %c0_3] : memref<16x32xbf16, #tpu.memory_space<vmem>>, vector<16x32xbf16>
    %c0_4 = arith.constant 0 : index
    %c0_5 = arith.constant 0 : index
    %5 = vector.load %arg4[%c0_4, %c0_5] : memref<32x32xbf16, #tpu.memory_space<vmem>>, vector<32x32xbf16>
    %cst = arith.constant dense<0.000000e+00> : vector<16x32xf32>
    %6 = tpu.matmul %4, %5, %cst {dimension_numbers = #tpu.dot_dimension_numbers<[1], [0], [0], [1], [0, 0, 1, 1], [], []>} : vector<16x32xbf16>, vector<32x32xbf16>, vector<16x32xf32> -> vector<16x32xf32>
    %7 = arith.addf %3, %6 : vector<16x32xf32>
    %c0_6 = arith.constant 0 : index
    %c0_7 = arith.constant 0 : index
    %8 = vector.load %arg10[%c0_6, %c0_7] : memref<16x32xf32, #tpu.memory_space<vmem>>, vector<16x32xf32>
    tpu.vector_store %arg10[%c0_6, %c0_7], %7 {strides = array<i32>} : memref<16x32xf32, #tpu.memory_space<vmem>>, vector<16x32xf32>,
    %c0_i32_8 = arith.constant 0 : i32
    %9 = arith.cmpi eq, %arg2, %c0_i32_8 : i32
    %10 = arith.extui %9 : i1 to i32
    %c0_i32_9 = arith.constant 0 : i32
    %11 = arith.cmpi ne, %10, %c0_i32_9 : i32
    scf.if %11 {
      %c0_10 = arith.constant 0 : index
      %c0_11 = arith.constant 0 : index
      %12 = vector.load %arg10[%c0_10, %c0_11] : memref<16x32xf32, #tpu.memory_space<vmem>>, vector<16x32xf32>
      %c0_12 = arith.constant 0 : index
      %c0_13 = arith.constant 0 : index
      %13 = vector.load %arg5[%c0_12, %c0_13] : memref<1x32xf32, #tpu.memory_space<vmem>>, vector<1x32xf32>
      %14 = vector.broadcast %13 : vector<1x32xf32> to vector<16x32xf32>
      %15 = arith.addf %12, %14 : vector<16x32xf32>
      %c0_14 = arith.constant 0 : index
      %c0_15 = arith.constant 0 : index
      %16 = vector.load %arg6[%c0_14, %c0_15] : memref<16x32xbf16, #tpu.memory_space<vmem>>, vector<16x32xbf16>
      %17 = arith.extf %16 : vector<16x32xbf16> to vector<16x32xf32>
      %18 = arith.addf %15, %17 : vector<16x32xf32>
      %cst_16 = arith.constant dense<0.000000e+00> : vector<16xf32>
      %19 = vector.multi_reduction <add>, %18, %cst_16 [1] : vector<16x32xf32> to vector<16xf32>
      %20 = vector.shape_cast %19 : vector<16xf32> to vector<16x1xf32>
      %cst_17 = arith.constant 3.200000e+01 : f32
      %21 = vector.broadcast %cst_17 : f32 to vector<16x1xf32>
      %22 = arith.divf %20, %21 : vector<16x1xf32>
      %23 = vector.broadcast %22 : vector<16x1xf32> to vector<16x32xf32>
      %24 = arith.subf %18, %23 : vector<16x32xf32>
      %25 = arith.mulf %24, %24 : vector<16x32xf32>
      %cst_18 = arith.constant dense<0.000000e+00> : vector<16xf32>
      %26 = vector.multi_reduction <add>, %25, %cst_18 [1] : vector<16x32xf32> to vector<16xf32>
      %27 = vector.shape_cast %26 : vector<16xf32> to vector<16x1xf32>
      %cst_19 = arith.constant 3.200000e+01 : f32
      %28 = vector.broadcast %cst_19 : f32 to vector<16x1xf32>
      %29 = arith.divf %27, %28 : vector<16x1xf32>
      %cst_20 = arith.constant 9.99999996E-13 : f32
      %30 = vector.broadcast %cst_20 : f32 to vector<16x1xf32>
      %31 = arith.addf %29, %30 : vector<16x1xf32>
      %32 = math.rsqrt %31 : vector<16x1xf32>
      %33 = vector.broadcast %32 : vector<16x1xf32> to vector<16x32xf32>
      %34 = arith.mulf %24, %33 : vector<16x32xf32>
      %c0_21 = arith.constant 0 : index
      %c0_22 = arith.constant 0 : index
      %35 = vector.load %arg7[%c0_21, %c0_22] : memref<1x32xf32, #tpu.memory_space<vmem>>, vector<1x32xf32>
      %36 = vector.broadcast %35 : vector<1x32xf32> to vector<16x32xf32>
      %37 = arith.mulf %34, %36 : vector<16x32xf32>
      %c0_23 = arith.constant 0 : index
      %c0_24 = arith.constant 0 : index
      %38 = vector.load %arg8[%c0_23, %c0_24] : memref<1x32xf32, #tpu.memory_space<vmem>>, vector<1x32xf32>
      %39 = vector.broadcast %38 : vector<1x32xf32> to vector<16x32xf32>
      %40 = arith.addf %37, %39 : vector<16x32xf32>
      %41 = arith.truncf %40 : vector<16x32xf32> to vector<16x32xbf16>
      %c0_25 = arith.constant 0 : index
      %c0_26 = arith.constant 0 : index
      %42 = vector.load %arg9[%c0_25, %c0_26] : memref<16x32xbf16, #tpu.memory_space<vmem>>, vector<16x32xbf16>
      tpu.vector_store %arg9[%c0_25, %c0_26], %41 {strides = array<i32>} : memref<16x32xbf16, #tpu.memory_space<vmem>>, vector<16x32xbf16>,
    } else {
    }
    return
  }
  func.func @transform_0(%arg0: i32, %arg1: i32, %arg2: i32) -> (i32, i32) {
    %c0_i32 = arith.constant 0 : i32
    return %arg0, %arg2 : i32, i32
  }
  func.func @transform_1(%arg0: i32, %arg1: i32, %arg2: i32) -> (i32, i32) {
    %c0_i32 = arith.constant 0 : i32
    return %arg2, %arg1 : i32, i32
  }
  func.func @transform_2(%arg0: i32, %arg1: i32, %arg2: i32) -> (i32, i32) {
    %c0_i32 = arith.constant 0 : i32
    %c0_i32_0 = arith.constant 0 : i32
    return %c0_i32, %arg1 : i32, i32
  }
  func.func @transform_3(%arg0: i32, %arg1: i32, %arg2: i32) -> (i32, i32) {
    %c0_i32 = arith.constant 0 : i32
    return %arg0, %arg1 : i32, i32
  }
  func.func @transform_4(%arg0: i32, %arg1: i32, %arg2: i32) -> (i32, i32) {
    %c0_i32 = arith.constant 0 : i32
    %c0_i32_0 = arith.constant 0 : i32
    return %c0_i32, %arg1 : i32, i32
  }
  func.func @transform_5(%arg0: i32, %arg1: i32, %arg2: i32) -> (i32, i32) {
    %c0_i32 = arith.constant 0 : i32
    %c0_i32_0 = arith.constant 0 : i32
    return %c0_i32, %arg1 : i32, i32
  }
  func.func @transform_6(%arg0: i32, %arg1: i32, %arg2: i32) -> (i32, i32) {
    %c0_i32 = arith.constant 0 : i32
    return %arg0, %arg1 : i32, i32
  }
}

module attributes {stable_mosaic.version = 11 : i64} {
  func.func @_dense_kernel(%arg0: i32, %arg1: i32, %arg2: i32, %arg3: memref<16x32xbf16, #tpu.memory_space<vmem>>, %arg4: memref<32x64xbf16, #tpu.memory_space<vmem>>, %arg5: memref<1x64xf32, #tpu.memory_space<vmem>>, %arg6: memref<16x64xbf16, #tpu.memory_space<vmem>>, %arg7: memref<16x64xf32, #tpu.memory_space<vmem>>) attributes {dimension_semantics = [#tpu.dimension_semantics<parallel>, #tpu.dimension_semantics<parallel>, #tpu.dimension_semantics<arbitrary>], iteration_bounds = array<i64: 1, 1, 1>, scalar_prefetch = 0 : i64, scratch_operands = 1 : i64, tpu.core_type = #tpu.core_type<tc>, window_params = [{transform_indices = @transform_0, window_bounds = array<i64: 16, 32>}, {transform_indices = @transform_1, window_bounds = array<i64: 32, 64>}, {transform_indices = @transform_2, window_bounds = array<i64: 1, 64>}, {transform_indices = @transform_3, window_bounds = array<i64: 16, 64>}]} {
    %c0_i32 = arith.constant 0 : i32
    %0 = arith.cmpi eq, %arg2, %c0_i32 : i32
    %1 = arith.extui %0 : i1 to i32
    %c0_i32_0 = arith.constant 0 : i32
    %2 = arith.cmpi ne, %1, %c0_i32_0 : i32
    scf.if %2 {
      %cst_10 = arith.constant 0.000000e+00 : f32
      %12 = vector.broadcast %cst_10 : f32 to vector<16x64xf32>
      %c0_11 = arith.constant 0 : index
      %c0_12 = arith.constant 0 : index
      %13 = vector.load %arg7[%c0_11, %c0_12] : memref<16x64xf32, #tpu.memory_space<vmem>>, vector<16x64xf32>
      tpu.vector_store %arg7[%c0_11, %c0_12], %12 {strides = array<i32>} : memref<16x64xf32, #tpu.memory_space<vmem>>, vector<16x64xf32>,
    } else {
    }
    %c0 = arith.constant 0 : index
    %c0_1 = arith.constant 0 : index
    %3 = vector.load %arg7[%c0, %c0_1] : memref<16x64xf32, #tpu.memory_space<vmem>>, vector<16x64xf32>
    %c0_2 = arith.constant 0 : index
    %c0_3 = arith.constant 0 : index
    %4 = vector.load %arg3[%c0_2, %c0_3] : memref<16x32xbf16, #tpu.memory_space<vmem>>, vector<16x32xbf16>
    %c0_4 = arith.constant 0 : index
    %c0_5 = arith.constant 0 : index
    %5 = vector.load %arg4[%c0_4, %c0_5] : memref<32x64xbf16, #tpu.memory_space<vmem>>, vector<32x64xbf16>
    %cst = arith.constant dense<0.000000e+00> : vector<16x64xf32>
    %6 = tpu.matmul %4, %5, %cst {dimension_numbers = #tpu.dot_dimension_numbers<[1], [0], [0], [1], [0, 0, 1, 1], [], []>} : vector<16x32xbf16>, vector<32x64xbf16>, vector<16x64xf32> -> vector<16x64xf32>
    %7 = arith.addf %3, %6 : vector<16x64xf32>
    %c0_6 = arith.constant 0 : index
    %c0_7 = arith.constant 0 : index
    %8 = vector.load %arg7[%c0_6, %c0_7] : memref<16x64xf32, #tpu.memory_space<vmem>>, vector<16x64xf32>
    tpu.vector_store %arg7[%c0_6, %c0_7], %7 {strides = array<i32>} : memref<16x64xf32, #tpu.memory_space<vmem>>, vector<16x64xf32>,
    %c0_i32_8 = arith.constant 0 : i32
    %9 = arith.cmpi eq, %arg2, %c0_i32_8 : i32
    %10 = arith.extui %9 : i1 to i32
    %c0_i32_9 = arith.constant 0 : i32
    %11 = arith.cmpi ne, %10, %c0_i32_9 : i32
    scf.if %11 {
      %c0_10 = arith.constant 0 : index
      %c0_11 = arith.constant 0 : index
      %12 = vector.load %arg7[%c0_10, %c0_11] : memref<16x64xf32, #tpu.memory_space<vmem>>, vector<16x64xf32>
      %c0_12 = arith.constant 0 : index
      %c0_13 = arith.constant 0 : index
      %13 = vector.load %arg5[%c0_12, %c0_13] : memref<1x64xf32, #tpu.memory_space<vmem>>, vector<1x64xf32>
      %14 = vector.broadcast %13 : vector<1x64xf32> to vector<16x64xf32>
      %15 = arith.addf %12, %14 : vector<16x64xf32>
      %16 = arith.mulf %15, %15 : vector<16x64xf32>
      %17 = arith.mulf %15, %16 : vector<16x64xf32>
      %cst_14 = arith.constant 4.471500e-02 : f32
      %18 = vector.broadcast %cst_14 : f32 to vector<16x64xf32>
      %19 = arith.mulf %18, %17 : vector<16x64xf32>
      %20 = arith.addf %15, %19 : vector<16x64xf32>
      %cst_15 = arith.constant 0.797884583 : f32
      %21 = vector.broadcast %cst_15 : f32 to vector<16x64xf32>
      %22 = arith.mulf %21, %20 : vector<16x64xf32>
      %23 = math.tanh %22 : vector<16x64xf32>
      %cst_16 = arith.constant 1.000000e+00 : f32
      %24 = vector.broadcast %cst_16 : f32 to vector<16x64xf32>
      %25 = arith.addf %24, %23 : vector<16x64xf32>
      %cst_17 = arith.constant 5.000000e-01 : f32
      %26 = vector.broadcast %cst_17 : f32 to vector<16x64xf32>
      %27 = arith.mulf %26, %25 : vector<16x64xf32>
      %28 = arith.mulf %15, %27 : vector<16x64xf32>
      %29 = arith.truncf %28 : vector<16x64xf32> to vector<16x64xbf16>
      %c0_18 = arith.constant 0 : index
      %c0_19 = arith.constant 0 : index
      %30 = vector.load %arg6[%c0_18, %c0_19] : memref<16x64xbf16, #tpu.memory_space<vmem>>, vector<16x64xbf16>
      tpu.vector_store %arg6[%c0_18, %c0_19], %29 {strides = array<i32>} : memref<16x64xbf16, #tpu.memory_space<vmem>>, vector<16x64xbf16>,
    } else {
    }
    return
  }
  func.func @transform_0(%arg0: i32, %arg1: i32, %arg2: i32) -> (i32, i32) {
    %c0_i32 = arith.constant 0 : i32
    return %arg0, %arg2 : i32, i32
  }
  func.func @transform_1(%arg0: i32, %arg1: i32, %arg2: i32) -> (i32, i32) {
    %c0_i32 = arith.constant 0 : i32
    return %arg2, %arg1 : i32, i32
  }
  func.func @transform_2(%arg0: i32, %arg1: i32, %arg2: i32) -> (i32, i32) {
    %c0_i32 = arith.constant 0 : i32
    %c0_i32_0 = arith.constant 0 : i32
    return %c0_i32, %arg1 : i32, i32
  }
  func.func @transform_3(%arg0: i32, %arg1: i32, %arg2: i32) -> (i32, i32) {
    %c0_i32 = arith.constant 0 : i32
    return %arg0, %arg1 : i32, i32
  }
}

module attributes {stable_mosaic.version = 11 : i64} {
  func.func @_dense_kernel(%arg0: i32, %arg1: i32, %arg2: i32, %arg3: memref<16x64xbf16, #tpu.memory_space<vmem>>, %arg4: memref<64x32xbf16, #tpu.memory_space<vmem>>, %arg5: memref<1x32xf32, #tpu.memory_space<vmem>>, %arg6: memref<16x32xbf16, #tpu.memory_space<vmem>>, %arg7: memref<1x32xf32, #tpu.memory_space<vmem>>, %arg8: memref<1x32xf32, #tpu.memory_space<vmem>>, %arg9: memref<16x32xbf16, #tpu.memory_space<vmem>>, %arg10: memref<16x32xf32, #tpu.memory_space<vmem>>) attributes {dimension_semantics = [#tpu.dimension_semantics<parallel>, #tpu.dimension_semantics<parallel>, #tpu.dimension_semantics<arbitrary>], iteration_bounds = array<i64: 1, 1, 1>, scalar_prefetch = 0 : i64, scratch_operands = 1 : i64, tpu.core_type = #tpu.core_type<tc>, window_params = [{transform_indices = @transform_0, window_bounds = array<i64: 16, 64>}, {transform_indices = @transform_1, window_bounds = array<i64: 64, 32>}, {transform_indices = @transform_2, window_bounds = array<i64: 1, 32>}, {transform_indices = @transform_3, window_bounds = array<i64: 16, 32>}, {transform_indices = @transform_4, window_bounds = array<i64: 1, 32>}, {transform_indices = @transform_5, window_bounds = array<i64: 1, 32>}, {transform_indices = @transform_6, window_bounds = array<i64: 16, 32>}]} {
    %c0_i32 = arith.constant 0 : i32
    %0 = arith.cmpi eq, %arg2, %c0_i32 : i32
    %1 = arith.extui %0 : i1 to i32
    %c0_i32_0 = arith.constant 0 : i32
    %2 = arith.cmpi ne, %1, %c0_i32_0 : i32
    scf.if %2 {
      %cst_10 = arith.constant 0.000000e+00 : f32
      %12 = vector.broadcast %cst_10 : f32 to vector<16x32xf32>
      %c0_11 = arith.constant 0 : index
      %c0_12 = arith.constant 0 : index
      %13 = vector.load %arg10[%c0_11, %c0_12] : memref<16x32xf32, #tpu.memory_space<vmem>>, vector<16x32xf32>
      tpu.vector_store %arg10[%c0_11, %c0_12], %12 {strides = array<i32>} : memref<16x32xf32, #tpu.memory_space<vmem>>, vector<16x32xf32>,
    } else {
    }
    %c0 = arith.constant 0 : index
    %c0_1 = arith.constant 0 : index
    %3 = vector.load %arg10[%c0, %c0_1] : memref<16x32xf32, #tpu.memory_space<vmem>>, vector<16x32xf32>
    %c0_2 = arith.constant 0 : index
    %c0_3 = arith.constant 0 : index
    %4 = vector.load %arg3[%c0_2, %c0_3] : memref<16x64xbf16, #tpu.memory_space<vmem>>, vector<16x64xbf16>
    %c0_4 = arith.constant 0 : index
    %c0_5 = arith.constant 0 : index
    %5 = vector.load %arg4[%c0_4, %c0_5] : memref<64x32xbf16, #tpu.memory_space<vmem>>, vector<64x32xbf16>
    %cst = arith.constant dense<0.000000e+00> : vector<16x32xf32>
    %6 = tpu.matmul %4, %5, %cst {dimension_numbers = #tpu.dot_dimension_numbers<[1], [0], [0], [1], [0, 0, 1, 1], [], []>} : vector<16x64xbf16>, vector<64x32xbf16>, vector<16x32xf32> -> vector<16x32xf32>
    %7 = arith.addf %3, %6 : vector<16x32xf32>
    %c0_6 = arith.constant 0 : index
    %c0_7 = arith.constant 0 : index
    %8 = vector.load %arg10[%c0_6, %c0_7] : memref<16x32xf32, #tpu.memory_space<vmem>>, vector<16x32xf32>
    tpu.vector_store %arg10[%c0_6, %c0_7], %7 {strides = array<i32>} : memref<16x32xf32, #tpu.memory_space<vmem>>, vector<16x32xf32>,
    %c0_i32_8 = arith.constant 0 : i32
    %9 = arith.cmpi eq, %arg2, %c0_i32_8 : i32
    %10 = arith.extui %9 : i1 to i32
    %c0_i32_9 = arith.constant 0 : i32
    %11 = arith.cmpi ne, %10, %c0_i32_9 : i32
    scf.if %11 {
      %c0_10 = arith.constant 0 : index
      %c0_11 = arith.constant 0 : index
      %12 = vector.load %arg10[%c0_10, %c0_11] : memref<16x32xf32, #tpu.memory_space<vmem>>, vector<16x32xf32>
      %c0_12 = arith.constant 0 : index
      %c0_13 = arith.constant 0 : index
      %13 = vector.load %arg5[%c0_12, %c0_13] : memref<1x32xf32, #tpu.memory_space<vmem>>, vector<1x32xf32>
      %14 = vector.broadcast %13 : vector<1x32xf32> to vector<16x32xf32>
      %15 = arith.addf %12, %14 : vector<16x32xf32>
      %c0_14 = arith.constant 0 : index
      %c0_15 = arith.constant 0 : index
      %16 = vector.load %arg6[%c0_14, %c0_15] : memref<16x32xbf16, #tpu.memory_space<vmem>>, vector<16x32xbf16>
      %17 = arith.extf %16 : vector<16x32xbf16> to vector<16x32xf32>
      %18 = arith.addf %15, %17 : vector<16x32xf32>
      %cst_16 = arith.constant dense<0.000000e+00> : vector<16xf32>
      %19 = vector.multi_reduction <add>, %18, %cst_16 [1] : vector<16x32xf32> to vector<16xf32>
      %20 = vector.shape_cast %19 : vector<16xf32> to vector<16x1xf32>
      %cst_17 = arith.constant 3.200000e+01 : f32
      %21 = vector.broadcast %cst_17 : f32 to vector<16x1xf32>
      %22 = arith.divf %20, %21 : vector<16x1xf32>
      %23 = vector.broadcast %22 : vector<16x1xf32> to vector<16x32xf32>
      %24 = arith.subf %18, %23 : vector<16x32xf32>
      %25 = arith.mulf %24, %24 : vector<16x32xf32>
      %cst_18 = arith.constant dense<0.000000e+00> : vector<16xf32>
      %26 = vector.multi_reduction <add>, %25, %cst_18 [1] : vector<16x32xf32> to vector<16xf32>
      %27 = vector.shape_cast %26 : vector<16xf32> to vector<16x1xf32>
      %cst_19 = arith.constant 3.200000e+01 : f32
      %28 = vector.broadcast %cst_19 : f32 to vector<16x1xf32>
      %29 = arith.divf %27, %28 : vector<16x1xf32>
      %cst_20 = arith.constant 9.99999996E-13 : f32
      %30 = vector.broadcast %cst_20 : f32 to vector<16x1xf32>
      %31 = arith.addf %29, %30 : vector<16x1xf32>
      %32 = math.rsqrt %31 : vector<16x1xf32>
      %33 = vector.broadcast %32 : vector<16x1xf32> to vector<16x32xf32>
      %34 = arith.mulf %24, %33 : vector<16x32xf32>
      %c0_21 = arith.constant 0 : index
      %c0_22 = arith.constant 0 : index
      %35 = vector.load %arg7[%c0_21, %c0_22] : memref<1x32xf32, #tpu.memory_space<vmem>>, vector<1x32xf32>
      %36 = vector.broadcast %35 : vector<1x32xf32> to vector<16x32xf32>
      %37 = arith.mulf %34, %36 : vector<16x32xf32>
      %c0_23 = arith.constant 0 : index
      %c0_24 = arith.constant 0 : index
      %38 = vector.load %arg8[%c0_23, %c0_24] : memref<1x32xf32, #tpu.memory_space<vmem>>, vector<1x32xf32>
      %39 = vector.broadcast %38 : vector<1x32xf32> to vector<16x32xf32>
      %40 = arith.addf %37, %39 : vector<16x32xf32>
      %41 = arith.truncf %40 : vector<16x32xf32> to vector<16x32xbf16>
      %c0_25 = arith.constant 0 : index
      %c0_26 = arith.constant 0 : index
      %42 = vector.load %arg9[%c0_25, %c0_26] : memref<16x32xbf16, #tpu.memory_space<vmem>>, vector<16x32xbf16>
      tpu.vector_store %arg9[%c0_25, %c0_26], %41 {strides = array<i32>} : memref<16x32xbf16, #tpu.memory_space<vmem>>, vector<16x32xbf16>,
    } else {
    }
    return
  }
  func.func @transform_0(%arg0: i32, %arg1: i32, %arg2: i32) -> (i32, i32) {
    %c0_i32 = arith.constant 0 : i32
    return %arg0, %arg2 : i32, i32
  }
  func.func @transform_1(%arg0: i32, %arg1: i32, %arg2: i32) -> (i32, i32) {
    %c0_i32 = arith.constant 0 : i32
    return %arg2, %arg1 : i32, i32
  }
  func.func @transform_2(%arg0: i32, %arg1: i32, %arg2: i32) -> (i32, i32) {
    %c0_i32 = arith.constant 0 : i32
    %c0_i32_0 = arith.constant 0 : i32
    return %c0_i32, %arg1 : i32, i32
  }
  func.func @transform_3(%arg0: i32, %arg1: i32, %arg2: i32) -> (i32, i32) {
    %c0_i32 = arith.constant 0 : i32
    return %arg0, %arg1 : i32, i32
  }
  func.func @transform_4(%arg0: i32, %arg1: i32, %arg2: i32) -> (i32, i32) {
    %c0_i32 = arith.constant 0 : i32
    %c0_i32_0 = arith.constant 0 : i32
    return %c0_i32, %arg1 : i32, i32
  }
  func.func @transform_5(%arg0: i32, %arg1: i32, %arg2: i32) -> (i32, i32) {
    %c0_i32 = arith.constant 0 : i32
    %c0_i32_0 = arith.constant 0 : i32
    return %c0_i32, %arg1 : i32, i32
  }
  func.func @transform_6(%arg0: i32, %arg1: i32, %arg2: i32) -> (i32, i32) {
    %c0_i32 = arith.constant 0 : i32
    return %arg0, %arg1 : i32, i32
  }
}

module attributes {stable_mosaic.version = 11 : i64} {
  func.func @_mean_pool_kernel(%arg0: i32, %arg1: i32, %arg2: memref<2x8x32xbf16, #tpu.memory_space<vmem>>, %arg3: memref<2x8x1xf32, #tpu.memory_space<vmem>>, %arg4: memref<2x32xf32, #tpu.memory_space<vmem>>, %arg5: memref<2x32xf32, #tpu.memory_space<vmem>>, %arg6: memref<2x1xf32, #tpu.memory_space<vmem>>) attributes {dimension_semantics = [#tpu.dimension_semantics<parallel>, #tpu.dimension_semantics<arbitrary>], iteration_bounds = array<i64: 1, 1>, scalar_prefetch = 0 : i64, scratch_operands = 2 : i64, tpu.core_type = #tpu.core_type<tc>, window_params = [{transform_indices = @transform_0, window_bounds = array<i64: 2, 8, 32>}, {transform_indices = @transform_1, window_bounds = array<i64: 2, 8, 1>}, {transform_indices = @transform_2, window_bounds = array<i64: 2, 32>}]} {
    %c0_i32 = arith.constant 0 : i32
    %0 = arith.cmpi eq, %arg1, %c0_i32 : i32
    %1 = arith.extui %0 : i1 to i32
    %c0_i32_0 = arith.constant 0 : i32
    %2 = arith.cmpi ne, %1, %c0_i32_0 : i32
    scf.if %2 {
      %cst_17 = arith.constant 0.000000e+00 : f32
      %19 = vector.broadcast %cst_17 : f32 to vector<2x32xf32>
      %c0_18 = arith.constant 0 : index
      %c0_19 = arith.constant 0 : index
      %20 = vector.load %arg5[%c0_18, %c0_19] : memref<2x32xf32, #tpu.memory_space<vmem>>, vector<2x32xf32>
      tpu.vector_store %arg5[%c0_18, %c0_19], %19 {strides = array<i32>} : memref<2x32xf32, #tpu.memory_space<vmem>>, vector<2x32xf32>,
      %cst_20 = arith.constant 0.000000e+00 : f32
      %21 = vector.broadcast %cst_20 : f32 to vector<2x1xf32>
      %c0_21 = arith.constant 0 : index
      %c0_22 = arith.constant 0 : index
      %22 = vector.load %arg6[%c0_21, %c0_22] : memref<2x1xf32, #tpu.memory_space<vmem>>, vector<2x1xf32>
      tpu.vector_store %arg6[%c0_21, %c0_22], %21 {strides = array<i32>} : memref<2x1xf32, #tpu.memory_space<vmem>>, vector<2x1xf32>,
    } else {
    }
    %c0 = arith.constant 0 : index
    %c0_1 = arith.constant 0 : index
    %c0_2 = arith.constant 0 : index
    %3 = vector.load %arg2[%c0, %c0_1, %c0_2] : memref<2x8x32xbf16, #tpu.memory_space<vmem>>, vector<2x8x32xbf16>
    %4 = arith.extf %3 : vector<2x8x32xbf16> to vector<2x8x32xf32>
    %c0_3 = arith.constant 0 : index
    %c0_4 = arith.constant 0 : index
    %c0_5 = arith.constant 0 : index
    %5 = vector.load %arg3[%c0_3, %c0_4, %c0_5] : memref<2x8x1xf32, #tpu.memory_space<vmem>>, vector<2x8x1xf32>
    %c0_6 = arith.constant 0 : index
    %c0_7 = arith.constant 0 : index
    %6 = vector.load %arg5[%c0_6, %c0_7] : memref<2x32xf32, #tpu.memory_space<vmem>>, vector<2x32xf32>
    %7 = vector.broadcast %5 : vector<2x8x1xf32> to vector<2x8x32xf32>
    %8 = arith.mulf %4, %7 : vector<2x8x32xf32>
    %cst = arith.constant dense<0.000000e+00> : vector<2x32xf32>
    %9 = vector.multi_reduction <add>, %8, %cst [1] : vector<2x8x32xf32> to vector<2x32xf32>
    %10 = arith.addf %6, %9 : vector<2x32xf32>
    %c0_8 = arith.constant 0 : index
    %c0_9 = arith.constant 0 : index
    %11 = vector.load %arg5[%c0_8, %c0_9] : memref<2x32xf32, #tpu.memory_space<vmem>>, vector<2x32xf32>
    tpu.vector_store %arg5[%c0_8, %c0_9], %10 {strides = array<i32>} : memref<2x32xf32, #tpu.memory_space<vmem>>, vector<2x32xf32>,
    %c0_10 = arith.constant 0 : index
    %c0_11 = arith.constant 0 : index
    %12 = vector.load %arg6[%c0_10, %c0_11] : memref<2x1xf32, #tpu.memory_space<vmem>>, vector<2x1xf32>
    %cst_12 = arith.constant dense<0.000000e+00> : vector<2x1xf32>
    %13 = vector.multi_reduction <add>, %5, %cst_12 [1] : vector<2x8x1xf32> to vector<2x1xf32>
    %14 = arith.addf %12, %13 : vector<2x1xf32>
    %c0_13 = arith.constant 0 : index
    %c0_14 = arith.constant 0 : index
    %15 = vector.load %arg6[%c0_13, %c0_14] : memref<2x1xf32, #tpu.memory_space<vmem>>, vector<2x1xf32>
    tpu.vector_store %arg6[%c0_13, %c0_14], %14 {strides = array<i32>} : memref<2x1xf32, #tpu.memory_space<vmem>>, vector<2x1xf32>,
    %c0_i32_15 = arith.constant 0 : i32
    %16 = arith.cmpi eq, %arg1, %c0_i32_15 : i32
    %17 = arith.extui %16 : i1 to i32
    %c0_i32_16 = arith.constant 0 : i32
    %18 = arith.cmpi ne, %17, %c0_i32_16 : i32
    scf.if %18 {
      %c0_17 = arith.constant 0 : index
      %c0_18 = arith.constant 0 : index
      %19 = vector.load %arg5[%c0_17, %c0_18] : memref<2x32xf32, #tpu.memory_space<vmem>>, vector<2x32xf32>
      %c0_19 = arith.constant 0 : index
      %c0_20 = arith.constant 0 : index
      %20 = vector.load %arg6[%c0_19, %c0_20] : memref<2x1xf32, #tpu.memory_space<vmem>>, vector<2x1xf32>
      %cst_21 = arith.constant 9.99999971E-10 : f32
      %21 = vector.broadcast %cst_21 : f32 to vector<2x1xf32>
      %22 = arith.maximumf %20, %21 : vector<2x1xf32>
      %23 = vector.broadcast %22 : vector<2x1xf32> to vector<2x32xf32>
      %24 = arith.divf %19, %23 : vector<2x32xf32>
      %c0_22 = arith.constant 0 : index
      %c0_23 = arith.constant 0 : index
      %25 = vector.load %arg4[%c0_22, %c0_23] : memref<2x32xf32, #tpu.memory_space<vmem>>, vector<2x32xf32>
      tpu.vector_store %arg4[%c0_22, %c0_23], %24 {strides = array<i32>} : memref<2x32xf32, #tpu.memory_space<vmem>>, vector<2x32xf32>,
    } else {
    }
    return
  }
  func.func @transform_0(%arg0: i32, %arg1: i32) -> (i32, i32, i32) {
    %c0_i32 = arith.constant 0 : i32
    %c0_i32_0 = arith.constant 0 : i32
    return %arg0, %arg1, %c0_i32 : i32, i32, i32
  }
  func.func @transform_1(%arg0: i32, %arg1: i32) -> (i32, i32, i32) {
    %c0_i32 = arith.constant 0 : i32
    %c0_i32_0 = arith.constant 0 : i32
    return %arg0, %arg1, %c0_i32 : i32, i32, i32
  }
  func.func @transform_2(%arg0: i32, %arg1: i32) -> (i32, i32) {
    %c0_i32 = arith.constant 0 : i32
    %c0_i32_0 = arith.constant 0 : i32
    return %arg0, %c0_i32 : i32, i32
  }
}

</mosaic_0001>

<bundles_post_ra>
// kernel: sbert_embedding_forward.16
= control target key start
LH: loop header
LB: loop body
LE: loop exit
PB: predicated region body
PF: predicated region fallthrough
CT: control target
= control target key end

     0   :  { %vm16_vm0 = vcmask 261120   ;;  %vm70_vm1 = vcmask 257024   ;;  %s129_s0 = inlined_call_operand.vmem [shape: f32[16,32], index: 0, kind: input, shape index: {}]   ;;  %s130_s1 = inlined_call_operand.vmem [shape: f32[1,32], index: 1, kind: input, shape index: {}]   ;;  %s131_s2 = inlined_call_operand.vmem [shape: f32[1,32], index: 2, kind: input, shape index: {}]   ;;  %s132_s3 = inlined_call_operand.vmem [shape: bf16[16,32], index: 3, kind: output, shape index: {}]  }
   0x1   :  { %v14_v0 = vld [vmem:[%s129_s0] sm:$0xff]  ;;  %v15_v1 = vld [vmem:[%s129_s0 + $0x8] sm:$0xff] }
   0x2   :  { %v17_v2 = vsel %vm16_vm0, %v14_v0, 0.0  ;;  %v20_v3 = vsel %vm16_vm0, %v15_v1, 0.0  ;;  %v77_v21 = vld [vmem:[%s130_s1] ss:$0 sm:$0xff] }
   0x3   :  { %18 = vadd.xlane.f32.xlu0 %v17_v2  ;;  %v78_v23 = vld [vmem:[%s131_s2] ss:$0 sm:$0xff] }
   0x7   :  { %21 = vadd.xlane.f32.xlu0 %v20_v3 }
  0x8c   :  { %v19_v4 = vpop.xlane.xlu0 %18 }
  0x8d   :  { %v24_v5 = vmul.f32 0.03125, %v19_v4 }
  0x8f   :  { %v26_v6 = vsub.f32 %v14_v0, %v24_v5 }
  0x90   :  { %v22_v7 = vpop.xlane.xlu0 %21 }
  0x91   :  { %v25_v8 = vmul.f32 0.03125, %v22_v7  ;;  %v28_v9 = vmul.f32 %v26_v6, %v26_v6 }
  0x93   :  { %v27_v10 = vsub.f32 %v15_v1, %v25_v8  ;;  %v30_v11 = vsel %vm16_vm0, %v28_v9, 0.0 }
  0x94   :  { %31 = vadd.xlane.f32.xlu1 %v30_v11 }
  0x95   :  { %v29_v12 = vmul.f32 %v27_v10, %v27_v10 }
  0x97   :  { %v33_v13 = vsel %vm16_vm0, %v29_v12, 0.0 }
  0x98   :  { %34 = vadd.xlane.f32.xlu1 %v33_v13 }
 0x11d   :  { %v32_v14 = vpop.xlane.xlu1 %31 }
 0x11e   :  { %v36_v15 = vmul.f32 0.03125, %v32_v14 }
 0x120   :  { %v38_v16 = vadd.f32 1e-12, %v36_v15 }
 0x121   :  { %v35_v17 = vpop.xlane.xlu1 %34 }
 0x122   :  { %83 = vrsqrt.f32 %v38_v16  ;;  %v37_v18 = vmul.f32 0.03125, %v35_v17 }
 0x124   :  { %v39_v19 = vadd.f32 1e-12, %v37_v18 }
 0x126   :  { %85 = vrsqrt.f32 %v39_v19 }
 0x12f   :  { %v84_v20 = vpop.eup %83 }
 0x130   :  { %v42_v22 = vmul.f32 %v84_v20, %v26_v6 }
 0x132   :  { %v51_v24 = vmul.f32 %v77_v21, %v42_v22 }
 0x133   :  { %v86_v25 = vpop.eup %85 }
 0x134   :  { %v60_v26 = vadd.f32 %v78_v23, %v51_v24  ;;  %v43_v27 = vmul.f32 %v86_v25, %v27_v10 }
 0x136   :  { %v81_v28 = vpack.c.bf16 %v60_v26, %v60_v26  ;;  %v52_v29 = vmul.f32 %v77_v21, %v43_v27 }
 0x138   :  { %71 = vst.msk [vmem:[%s132_s3] sm:$0xf] %vm70_vm1, %v81_v28  ;;  %v61_v30 = vadd.f32 %v78_v23, %v52_v29 }
 0x13a   :  { %v82_v31 = vpack.c.bf16 %v61_v30, %v61_v30 }
 0x13c   :  { %72 = vst.msk [vmem:[%s132_s3 + $0x4] sm:$0xf] %vm70_vm1, %v82_v31 }

// kernel: sbert_embedding_forward.17
= control target key start
LH: loop header
LB: loop body
LE: loop exit
PB: predicated region body
PF: predicated region fallthrough
CT: control target
= control target key end

     0   :  { %vm19_vm0 = vcmask 261120   ;;  %v150_v0 = vmov 0.0   ;;  %vm151_vm1 = vmmov 0   ;;  %vm118_vm2 = vcmask 257024   ;;  %s195_s1 = inlined_call_operand.vmem [shape: bf16[32,32], index: 1, kind: input, shape index: {}]   ;;  %s196_s0 = inlined_call_operand.vmem [shape: bf16[16,32], index: 0, kind: input, shape index: {}]   ;;  %s197_s2 = inlined_call_operand.vmem [shape: f32[1,32], index: 2, kind: input, shape index: {}]   ;;  %s198_s3 = inlined_call_operand.vmem [shape: bf16[16,32], index: 3, kind: output, shape index: {}]  }
   0x1   :  { %137 = vmatprep.subr.bf16.mxu0 %v150_v0  ;;  %v147_v1 = vld [vmem:[%s195_s1 + $0x8] sm:$0xff]   ;;  %141 = vmatprep.mubr.msk.bf16.mxu0 %vm151_vm1, %v150_v0  ;;  %20 = vst.msk [vmem:[#allocation2] sm:$0xff] %vm19_vm0, %v150_v0  ;;  %21 = vst.msk [vmem:[#allocation2 + $0x8] sm:$0xff] %vm19_vm0, %v150_v0  ;;  %v148_v2 = vld [vmem:[%s195_s1] sm:$0xff]  }
   0x2   :  { %138 = vmatpush3.bf16.msra.mxu0 %v147_v1  ;;  %v149_v3 = vld [vmem:[%s196_s0] sm:$0xff]  }
   0x3   :  { %139 = vmatprep.subr.bf16.mxu0 %v150_v0  ;;  %v129_v12 = vld [vmem:[%s197_s2] ss:$0 sm:$0xff] }
   0x6   :  { %140 = vmatpush3.bf16.msra.mxu0 %v148_v2 }
   0x8   :  { %v22_v4 = vld [vmem:[#allocation2] sm:$0xff]  ;;  %v23_v8 = vld [vmem:[#allocation2 + $0x8] sm:$0xff] }
   0x9   :  { %142 = vmatmul.mubr.msk.bf16.vlgmr.msra.gmra.mxu0 %vm19_vm0, %v149_v3 }
  0xc9   :  { %v85_v5 = vpop.f32.mrf.mxu0 }
  0xca   :  { %v92_v6 = vadd.f32 %v85_v5, %v22_v4 }
  0xcb   :  { %v143_v7 = vpop.f32.mrf.mxu0 }
  0xcc   :  { %94 = vst.msk [vmem:[#allocation2] sm:$0xff] %vm19_vm0, %v92_v6 }
  0xcd   :  { %v88_v9 = vpop.f32.mrf.mxu0 }
  0xce   :  { %v93_v10 = vadd.f32 %v88_v9, %v23_v8 }
  0xcf   :  { %v144_v11 = vpop.f32.mrf.mxu0 }
  0xd0   :  { %95 = vst.msk [vmem:[#allocation2 + $0x8] sm:$0xff] %vm19_vm0, %v93_v10 }
  0xd3   :  { %v99_v13 = vld [vmem:[#allocation2] sm:$0xff] }
  0xd4   :  { %v108_v14 = vadd.f32 %v129_v12, %v99_v13 }
  0xd6   :  { %v132_v15 = vpack.c.bf16 %v108_v14, %v108_v14 }
  0xd7   :  { %v100_v16 = vld [vmem:[#allocation2 + $0x8] sm:$0xff] }
  0xd8   :  { %119 = vst.msk [vmem:[%s198_s3] sm:$0xf] %vm118_vm2, %v132_v15  ;;  %v109_v17 = vadd.f32 %v129_v12, %v100_v16 }
  0xda   :  { %v133_v18 = vpack.c.bf16 %v109_v17, %v109_v17 }
  0xdc   :  { %120 = vst.msk [vmem:[%s198_s3 + $0x4] sm:$0xf] %vm118_vm2, %v133_v18 }

// kernel: sbert_embedding_forward.21
= control target key start
LH: loop header
LB: loop body
LE: loop exit
PB: predicated region body
PF: predicated region fallthrough
CT: control target
= control target key end

     0   :  { %vm28_vm0 = vcmask 261120   ;;  %v220_v0 = vmov 0.0   ;;  %vm221_vm1 = vmmov 0   ;;  %vm178_vm2 = vcmask 257024   ;;  %s293_s1 = inlined_call_operand.vmem [shape: bf16[32,32], index: 1, kind: input, shape index: {}]   ;;  %s294_s0 = inlined_call_operand.vmem [shape: bf16[16,32], index: 0, kind: input, shape index: {}]   ;;  %s295_s3 = inlined_call_operand.vmem [shape: bf16[16,32], index: 3, kind: input, shape index: {}]   ;;  %s296_s2 = inlined_call_operand.vmem [shape: f32[1,32], index: 2, kind: input, shape index: {}]   ;;  %s297_s4 = inlined_call_operand.vmem [shape: f32[1,32], index: 4, kind: input, shape index: {}]   ;;  %s298_s5 = inlined_call_operand.vmem [shape: f32[1,32], index: 5, kind: input, shape index: {}]   ;;  %s299_s6 = inlined_call_operand.vmem [shape: bf16[16,32], index: 6, kind: output, shape index: {}]  }
   0x1   :  { %203 = vmatprep.subr.bf16.mxu0 %v220_v0  ;;  %v213_v1 = vld [vmem:[%s293_s1 + $0x8] sm:$0xff]   ;;  %207 = vmatprep.mubr.msk.bf16.mxu0 %vm221_vm1, %v220_v0  ;;  %29 = vst.msk [vmem:[#allocation2] sm:$0xff] %vm28_vm0, %v220_v0  ;;  %30 = vst.msk [vmem:[#allocation2 + $0x8] sm:$0xff] %vm28_vm0, %v220_v0  ;;  %v214_v2 = vld [vmem:[%s293_s1] sm:$0xff]  }
   0x2   :  { %204 = vmatpush3.bf16.msra.mxu0 %v213_v1  ;;  %v215_v3 = vld [vmem:[%s294_s0] sm:$0xff]  }
   0x3   :  { %205 = vmatprep.subr.bf16.mxu0 %v220_v0  ;;  %v197_v12 = vld [vmem:[%s295_s3] sm:$0xff]  }
   0x4   :  { %v189_v13 = vld [vmem:[%s296_s2] ss:$0 sm:$0xff]  ;;  %v198_v14 = vunpack.c.l.bf16 %v197_v12  ;;  %v199_v18 = vunpack.c.h.bf16 %v197_v12 }
   0x5   :  { %v190_v41 = vld [vmem:[%s297_s4] ss:$0 sm:$0xff] }
   0x6   :  { %206 = vmatpush3.bf16.msra.mxu0 %v214_v2  ;;  %v191_v43 = vld [vmem:[%s298_s5] ss:$0 sm:$0xff] }
   0x8   :  { %v31_v4 = vld [vmem:[#allocation2] sm:$0xff]  ;;  %v32_v8 = vld [vmem:[#allocation2 + $0x8] sm:$0xff] }
   0x9   :  { %208 = vmatmul.mubr.msk.bf16.vlgmr.msra.gmra.mxu0 %vm28_vm0, %v215_v3 }
  0xc9   :  { %v94_v5 = vpop.f32.mrf.mxu0 }
  0xca   :  { %v101_v6 = vadd.f32 %v94_v5, %v31_v4 }
  0xcb   :  { %v209_v7 = vpop.f32.mrf.mxu0 }
  0xcc   :  { %103 = vst.msk [vmem:[#allocation2] sm:$0xff] %vm28_vm0, %v101_v6 }
  0xcd   :  { %v97_v9 = vpop.f32.mrf.mxu0 }
  0xce   :  { %v102_v10 = vadd.f32 %v97_v9, %v32_v8 }
  0xcf   :  { %v210_v11 = vpop.f32.mrf.mxu0 }
  0xd0   :  { %104 = vst.msk [vmem:[#allocation2 + $0x8] sm:$0xff] %vm28_vm0, %v102_v10 }
  0xd3   :  { %v108_v15 = vld [vmem:[#allocation2] sm:$0xff] }
  0xd4   :  { %v117_v16 = vadd.f32 %v189_v13, %v108_v15 }
  0xd6   :  { %v123_v17 = vadd.f32 %v198_v14, %v117_v16 }
  0xd7   :  { %v109_v19 = vld [vmem:[#allocation2 + $0x8] sm:$0xff] }
  0xd8   :  { %v125_v20 = vsel %vm28_vm0, %v123_v17, 0.0  ;;  %v118_v21 = vadd.f32 %v189_v13, %v109_v19 }
  0xd9   :  { %126 = vadd.xlane.f32.xlu0 %v125_v20 }
  0xda   :  { %v124_v22 = vadd.f32 %v199_v18, %v118_v21 }
  0xdc   :  { %v128_v23 = vsel %vm28_vm0, %v124_v22, 0.0 }
  0xdd   :  { %129 = vadd.xlane.f32.xlu0 %v128_v23 }
 0x162   :  { %v127_v24 = vpop.xlane.xlu0 %126 }
 0x163   :  { %v132_v25 = vmul.f32 0.03125, %v127_v24 }
 0x165   :  { %v134_v26 = vsub.f32 %v123_v17, %v132_v25 }
 0x166   :  { %v130_v27 = vpop.xlane.xlu0 %129 }
 0x167   :  { %v133_v28 = vmul.f32 0.03125, %v130_v27  ;;  %v136_v29 = vmul.f32 %v134_v26, %v134_v26 }
 0x169   :  { %v135_v30 = vsub.f32 %v124_v22, %v133_v28  ;;  %v138_v31 = vsel %vm28_vm0, %v136_v29, 0.0 }
 0x16a   :  { %139 = vadd.xlane.f32.xlu1 %v138_v31 }
 0x16b   :  { %v137_v32 = vmul.f32 %v135_v30, %v135_v30 }
 0x16d   :  { %v141_v33 = vsel %vm28_vm0, %v137_v32, 0.0 }
 0x16e   :  { %142 = vadd.xlane.f32.xlu1 %v141_v33 }
 0x1f3   :  { %v140_v34 = vpop.xlane.xlu1 %139 }
 0x1f4   :  { %v144_v35 = vmul.f32 0.03125, %v140_v34 }
 0x1f6   :  { %v146_v36 = vadd.f32 1e-12, %v144_v35 }
 0x1f7   :  { %v143_v37 = vpop.xlane.xlu1 %142 }
 0x1f8   :  { %216 = vrsqrt.f32 %v146_v36  ;;  %v145_v38 = vmul.f32 0.03125, %v143_v37 }
 0x1fa   :  { %v147_v39 = vadd.f32 1e-12, %v145_v38 }
 0x1fc   :  { %218 = vrsqrt.f32 %v147_v39 }
 0x205   :  { %v217_v40 = vpop.eup %216 }
 0x206   :  { %v150_v42 = vmul.f32 %v217_v40, %v134_v26 }
 0x208   :  { %v159_v44 = vmul.f32 %v190_v41, %v150_v42 }
 0x209   :  { %v219_v45 = vpop.eup %218 }
 0x20a   :  { %v168_v46 = vadd.f32 %v191_v43, %v159_v44  ;;  %v151_v47 = vmul.f32 %v219_v45, %v135_v30 }
 0x20c   :  { %v194_v48 = vpack.c.bf16 %v168_v46, %v168_v46  ;;  %v160_v49 = vmul.f32 %v190_v41, %v151_v47 }
 0x20e   :  { %179 = vst.msk [vmem:[%s299_s6] sm:$0xf] %vm178_vm2, %v194_v48  ;;  %v169_v50 = vadd.f32 %v191_v43, %v160_v49 }
 0x210   :  { %v195_v51 = vpack.c.bf16 %v169_v50, %v169_v50 }
 0x212   :  { %180 = vst.msk [vmem:[%s299_s6 + $0x4] sm:$0xf] %vm178_vm2, %v195_v51 }

// kernel: sbert_embedding_forward.20
= control target key start
LH: loop header
LB: loop body
LE: loop exit
PB: predicated region body
PF: predicated region fallthrough
CT: control target
= control target key end

     0   :  { %s908_s15 = smov 0   ;;  %s910_s16 = smov 0   ;;  %s997_s0 = inlined_call_operand.vmem [shape: bf16[2,8,32], index: 0, kind: input, shape index: {}]   ;;  %s998_s1 = inlined_call_operand.vmem [shape: bf16[2,8,32], index: 1, kind: input, shape index: {}]   ;;  %s999_s2 = inlined_call_operand.vmem [shape: bf16[2,8,32], index: 2, kind: input, shape index: {}]   ;;  %s1000_s3 = inlined_call_operand.vmem [shape: f32[2,1,8], index: 3, kind: input, shape index: {}]   ;;  %s1001_s4 = inlined_call_operand.vmem [shape: bf16[2,8,32], index: 4, kind: output, shape index: {}]  }
   0x1   :  { %s912_s17 = smov 0  }
   0x2 LB: > { %s33_s18 = sadd.s32 1, %s871_s16  ;;  %p761_p0 = scmp.ge.s32.totalorder %s875_s17, 1  ;;  %s875_s17 = sphi %s912_s17, %s14_s17   ;;  %s871_s16 = sphi %s910_s16, %s1003_s16   ;;  %s867_s15 = sphi %s908_s15, %s1002_s15  }
   0x3   : > { %p35_p1 = scmp.ge.s32.totalorder %s33_s18, 2  ;;  %p228_p2 = scmp.lt.s32.totalorder %s875_s17, 3 }
   0x5   : > { %s1005_s18 = smov (%p35_p1, %s33_s18), 0  ;;  %p229_p3 = pnand %p761_p0, %p228_p2 }
   0x6   : > { %p278_p4 = scmp.lt.s32.totalorder (!%p229_p3), %s867_s15, 1  ;;  %s881_s29 = smov (!%p229_p3), 112  }
   0x7   : > { %232 = sbr.rel (%p229_p3) target bundleno = 1398 (0x576), region = 36  ;;  %s882_s7 = smov (!%p229_p3), 16  }
   0xc   : > { %vm322_vm0 = vcmask 130048   ;;  %v877_v0 = vmov 0.0   ;;  %vm878_vm1 = vmmov 0   ;;  %s1007_s15 = smov (!%p278_p4, %s867_s15), 1  ;;  %vm317_vm2 = vcmask 7168  }
   0xd   : > { %784 = vmatprep.subr.bf16.mxu0 %v877_v0  ;;  %323 = vst.msk [vmem:[#allocation4] sm:$0xff] %vm322_vm0, %v877_v0  ;;  %324 = vst.msk [vmem:[#allocation4 + $0x8] sm:$0xff] %vm322_vm0, %v877_v0  ;;  %786 = vmatprep.mubr.msk.bf16.mxu0 %vm878_vm1, %v877_v0  ;;  %s936_s19 = sshll.u32 %s1007_s15, 2  ;;  %v879_v4 = vmov -inf   ;;  %s304_s28 = scalar_lea.vmem %s1000_s3, %s1007_s15  ;;  %vm383_vm3 = vcmask 64512   ;;  %v880_v12 = vmov 0  }
   0xe   : > { %790 = vmatprep.subr.bf16.mxu1 %v877_v0  ;;  %792 = vmatprep.mubr.msk.bf16.mxu1 %vm878_vm1, %v877_v0  ;;  %s291_s22 = scalar_lea.vmem %s998_s1, %s936_s19  ;;  %s284_s25 = scalar_lea.vmem %s997_s0, %s936_s19  ;;  %318 = vst.msk [vmem:[#allocation2] sm:$0xff] %vm317_vm2, %v879_v4  ;;  %319 = vst.msk [vmem:[#allocation2 + $0x8] sm:$0xff] %vm317_vm2, %v879_v4  ;;  %v766_v5 = vld [vmem:[%s304_s28] ss:$0 sm:$0xff]  ;;  %vm418_vm4 = vcmask 1043456   ;;  %vm636_vm5 = vcmask 257024  }
   0xf   : > { %v326_v1 = vld [vmem:[%s291_s22] sm:$0xf]  ;;  %320 = vst.msk [vmem:[#allocation3] sm:$0xff] %vm317_vm2, %v877_v0  ;;  %321 = vst.msk [vmem:[#allocation3 + $0x8] sm:$0xff] %vm317_vm2, %v877_v0  ;;  %838 = vset.pattern.permute.xlu0 %v880_v12  ;;  %839 = vset.pattern.permute.xlu1 %v880_v12  ;;  %s298_s6 = scalar_lea.vmem %s999_s2, %s936_s19  ;;  %s311_s10 = scalar_lea.vmem %s1001_s4, %s936_s19 }
  0x10   : > { %v340_v2 = vsel %vm322_vm0, %v326_v1, 0  ;;  %v325_v3 = vld [vmem:[%s284_s25] sm:$0xf]  ;;  %v770_v13 = vcombine.low %v326_v1, %v326_v1 }
  0x11   : > { %785 = vmatpush3.bf16.xpose.msra.mxu0 %v340_v2  ;;  %v769_v14 = vcombine.low %v325_v3, %v325_v3  ;;  %v327_v19 = vld [vmem:[%s298_s6] sm:$0xf] }
  0x12   : > { %802 = vmatprep.subr.bf16.mxu0 %v877_v0  ;;  %473 = vrot.lane.b32.xlu1 %v770_v13, %s881_s29  ;;  %v420_v20 = vsel %vm418_vm4, %v327_v19, 0  ;;  %v772_v21 = vcombine.low %v327_v19, %v327_v19 }
  0x13   : > { %791 = vmatpush3.bf16.msra.mxu1 %v420_v20 }
  0x14   : > { %796 = vmatprep.subr.bf16.mxu1 %v877_v0  ;;  %v407_v4 = vld [vmem:[#allocation4] sm:$0xff] }
  0x15   : > { %v382_v15 = vld [vmem:[#allocation2] sm:$0xff]  ;;  %v522_v40 = vld [vmem:[#allocation2 + $0x8] sm:$0xff] }
  0x16   : > { %468 = vrot.lane.b32.xlu1 %v769_v14, %s881_s29  ;;  %v399_v57 = vld [vmem:[#allocation3] sm:$0xff]  ;;  %v539_v63 = vld [vmem:[#allocation3 + $0x8] sm:$0xff] }
  0x18   : > { %787 = vmatmul.mubr.msk.bf16.vlgmr.msra.gmra.mxu0 %vm322_vm0, %v325_v3 }
  0x19   : > { %804 = vmatprep.mubr.msk.bf16.mxu0 %vm878_vm1, %v877_v0 }
  0x84   : > { %v474_v25 = vpop.permute.xlu1 %473 }
  0x85   : > { %v479_v27 = vsel %vm322_vm0, %v474_v25, 0 }
  0x88   : > { %v469_v29 = vpop.permute.xlu1 %468 }
  0xd8   : > { %v376_v6 = vpop.f32.mrf.mxu0 }
  0xd9   : > { %v377_v7 = vadd.f32 %v766_v5, %v376_v6 }
  0xda   : > { %v788_v8 = vpop.f32.mrf.mxu0 }
  0xdb   : > { %v384_v9 = vsel %vm383_vm3, %v377_v7, -inf }
  0xdc   : > { %385 = vmax.xlane.f32.xlu0 %v384_v9  ;;  %v379_v10 = vpop.f32.mrf.mxu0 }
  0xdd   : > { %v547_v10 = vld [vmem:[#allocation4 + $0x8] sm:$0xff] }
  0xde   : > { %v789_v11 = vpop.f32.mrf.mxu0 }
 0x165   : > { %v386_v16 = vpop.xlane.xlu0 %385 }
 0x166   : > { %v387_v17 = vmax.f32 %v382_v15, %v386_v16 }
 0x168   : > { %v388_v18 = vsub.f32 %v382_v15, %v387_v17  ;;  %464 = vst.msk [vmem:[#allocation2] sm:$0xff] %vm317_vm2, %v387_v17  ;;  %393 = vperm.xlu0 %838, %v387_v17  }
 0x16a   : > { %v389_v54 = vmul.f32 1.442695, %v388_v18 }
 0x16c   : > { %558 = vrot.lane.b32.xlu0 %v772_v21, %s881_s29 }
 0x1e3   : > { %v394_v22 = vpop.permute.xlu0 %393 }
 0x1e4   : > { %v396_v23 = vsub.f32 %v377_v7, %v394_v22 }
 0x1e6   : > { %v397_v24 = vmul.f32 1.442695, %v396_v23 }
 0x1e7   : > { %v559_v44 = vpop.permute.xlu0 %558 }
 0x1e8   : > { %841 = vpow2.f32 %v397_v24  ;;  %v564_v45 = vsel %vm418_vm4, %v559_v44, 0 }
 0x1e9   : > { %803 = vmatpush3.bf16.msra.mxu0 %v564_v45 }
 0x1f5   : > { %v842_v26 = vpop.eup %841 }
 0x1f6   : > { %v414_v28 = vpack.c.bf16 %v842_v26, %v842_v26  ;;  %v401_v46 = vsel %vm383_vm3, %v842_v26, 0.0 }
 0x1f8   : > { %793 = vmatmul.mubr.msk.bf16.vlgmr.msra.gmra.mxu1 %vm383_vm3, %v414_v28 }
 0x1f9   : > { %797 = vmatpush3.bf16.xpose.msra.mxu1 %v479_v27  ;;  %798 = vmatprep.mubr.msk.bf16.mxu1 %vm878_vm1, %v877_v0 }
 0x200   : > { %799 = vmatmul.mubr.msk.bf16.vlgmr.msra.gmra.mxu1 %vm322_vm0, %v469_v29 }
 0x2b8   : > { %v456_v30 = vpop.f32.mrf.mxu1 }
 0x2ba   : > { %v794_v31 = vpop.f32.mrf.mxu1 }
 0x2bc   : > { %v459_v32 = vpop.f32.mrf.mxu1 }
 0x2be   : > { %v795_v33 = vpop.f32.mrf.mxu1 }
 0x2c0   : > { %v515_v34 = vpop.f32.mrf.mxu1 }
 0x2c1   : > { %v516_v35 = vadd.f32 %v766_v5, %v515_v34 }
 0x2c2   : > { %v800_v36 = vpop.f32.mrf.mxu1 }
 0x2c3   : > { %v523_v37 = vsel %vm383_vm3, %v516_v35, -inf }
 0x2c4   : > { %524 = vmax.xlane.f32.xlu1 %v523_v37  ;;  %v518_v38 = vpop.f32.mrf.mxu1 }
 0x2c6   : > { %v801_v39 = vpop.f32.mrf.mxu1 }
 0x34d   : > { %v525_v41 = vpop.xlane.xlu1 %524 }
 0x34e   : > { %v526_v42 = vmax.f32 %v522_v40, %v525_v41 }
 0x350   : > { %v527_v43 = vsub.f32 %v522_v40, %v526_v42  ;;  %608 = vst.msk [vmem:[#allocation2 + $0x8] sm:$0xff] %vm317_vm2, %v526_v42  ;;  %532 = vperm.xlu1 %839, %v526_v42  }
 0x352   : > { %v528_v53 = vmul.f32 1.442695, %v527_v43 }
 0x374   : > { %402 = vadd.xlane.f32.xlu1 %v401_v46 }
 0x3cb   : > { %v533_v47 = vpop.permute.xlu1 %532 }
 0x3cc   : > { %v535_v48 = vsub.f32 %v516_v35, %v533_v47 }
 0x3ce   : > { %v536_v49 = vmul.f32 1.442695, %v535_v48 }
 0x3d0   : > { %843 = vpow2.f32 %v536_v49 }
 0x3d1   : > { %845 = vpow2.f32 %v528_v53 }
 0x3d2   : > { %847 = vpow2.f32 %v389_v54 }
 0x3dd   : > { %v844_v50 = vpop.eup %843 }
 0x3de   : > { %v541_v51 = vsel %vm383_vm3, %v844_v50, 0.0  ;;  %v554_v52 = vpack.c.bf16 %v844_v50, %v844_v50  ;;  %v846_v55 = vpop.eup %845 }
 0x3df   : > { %542 = vadd.xlane.f32.xlu0 %v541_v51  ;;  %v848_v56 = vpop.eup %847  ;;  %v540_v0 = vmul.f32 %v846_v55, %v539_v63 }
 0x3e0   : > { %805 = vmatmul.mubr.msk.bf16.vlgmr.msra.gmra.mxu0 %vm383_vm3, %v554_v52  ;;  %v400_v58 = vmul.f32 %v848_v56, %v399_v57 }
 0x3f5   : > { %550 = vperm.xlu0 %838, %v846_v55  }
 0x3f9   : > { %410 = vperm.xlu0 %838, %v848_v56  }
 0x3fd   : > { %v403_v59 = vpop.xlane.xlu1 %402 }
 0x3fe   : > { %v404_v60 = vadd.f32 %v403_v59, %v400_v58 }
 0x400   : > { %406 = vst.msk [vmem:[#allocation3] sm:$0xff] %vm317_vm2, %v404_v60 }
 0x407   : > { %v613_v61 = vld [vmem:[#allocation3] sm:$0xff] }
 0x408   : > { %849 = vrcp.f32 %v613_v61 }
 0x415   : > { %v850_v62 = vpop.eup %849 }
 0x416   : > { %617 = vperm.xlu0 %838, %v850_v62  }
 0x468   : > { %v543_v1 = vpop.xlane.xlu0 %542 }
 0x469   : > { %v544_v2 = vadd.f32 %v543_v1, %v540_v0 }
 0x46b   : > { %545 = vst.msk [vmem:[#allocation3 + $0x8] sm:$0xff] %vm317_vm2, %v544_v2 }
 0x470   : > { %v551_v3 = vpop.permute.xlu0 %550 }
 0x471   : > { %v553_v11 = vmul.f32 %v551_v3, %v547_v10 }
 0x472   : > { %v622_v5 = vld [vmem:[#allocation3 + $0x8] sm:$0xff] }
 0x473   : > { %851 = vrcp.f32 %v622_v5 }
 0x474   : > { %v411_v6 = vpop.permute.xlu0 %410 }
 0x475   : > { %v413_v7 = vmul.f32 %v411_v6, %v407_v4 }
 0x477   : > { %v462_v8 = vadd.f32 %v456_v30, %v413_v7 }
 0x479   : > { %463 = vst.msk [vmem:[#allocation4] sm:$0xff] %vm322_vm0, %v462_v8 }
 0x480   : > { %v852_v9 = vpop.eup %851  ;;  %v612_v21 = vld [vmem:[#allocation4] sm:$0xff] }
 0x481   : > { %626 = vperm.xlu1 %839, %v852_v9  }
 0x491   : > { %v618_v20 = vpop.permute.xlu0 %617 }
 0x492   : > { %v620_v22 = vmul.f32 %v618_v20, %v612_v21 }
 0x4a0   : > { %v600_v12 = vpop.f32.mrf.mxu0 }
 0x4a1   : > { %v606_v13 = vadd.f32 %v600_v12, %v553_v11 }
 0x4a2   : > { %v806_v14 = vpop.f32.mrf.mxu0 }
 0x4a3   : > { %607 = vst.msk [vmem:[#allocation4 + $0x8] sm:$0xff] %vm322_vm0, %v606_v13 }
 0x4a4   : > { %v603_v15 = vpop.f32.mrf.mxu0 }
 0x4a6   : > { %v807_v16 = vpop.f32.mrf.mxu0 }
 0x4aa   : > { %v621_v18 = vld [vmem:[#allocation4 + $0x8] sm:$0xff] }
 0x4fc   : > { %v627_v17 = vpop.permute.xlu1 %626 }
 0x4fd   : > { %v629_v19 = vmul.f32 %v627_v17, %v621_v18 }
 0x4ff   : > { %631 = vrot.lane.b32.xlu0 %v629_v19, %s882_s7 }
 0x571   : > { %v632_v23 = vpop.permute.xlu0 %631 }
 0x572   : > { %v634_v24 = vsel %vm322_vm0, %v620_v22, %v632_v23 }
 0x573   : > { %v635_v25 = vpack.c.bf16 %v634_v24, %v634_v24 }
 0x575   : > { %637 = vst.msk [vmem:[%s311_s10] sm:$0xf] %vm636_vm5, %v635_v25 }
 0x576 PF: > { %s14_s17 = sadd.s32 1, %s875_s17   ;;  %s1002_s15 = smov %s871_s16 }
 0x577   : > { %p11_p5 = scmp.ge.s32.totalorder %s14_s17, 4   ;;  %s1003_s16 = smov %s1005_s18 }
 0x579   :  { %13 = sbr.rel (!%p11_p5) target bundleno = 2 (0x2), region = 86 }

// kernel: sbert_embedding_forward.22
= control target key start
LH: loop header
LB: loop body
LE: loop exit
PB: predicated region body
PF: predicated region fallthrough
CT: control target
= control target key end

     0   :  { %vm19_vm0 = vcmask 523264   ;;  %v173_v0 = vmov 0.0   ;;  %vm174_vm1 = vmmov 0   ;;  %vm47_vm2 = vcmask 261120   ;;  %s217_s1 = inlined_call_operand.vmem [shape: bf16[32,64], index: 1, kind: input, shape index: {}]   ;;  %s218_s0 = inlined_call_operand.vmem [shape: bf16[16,32], index: 0, kind: input, shape index: {}]   ;;  %s219_s2 = inlined_call_operand.vmem [shape: f32[1,64], index: 2, kind: input, shape index: {}]   ;;  %s220_s3 = inlined_call_operand.vmem [shape: bf16[16,64], index: 3, kind: output, shape index: {}]  }
   0x1   :  { %156 = vmatprep.subr.bf16.mxu0 %v173_v0  ;;  %v166_v1 = vld [vmem:[%s217_s1 + $0x8] sm:$0xff]   ;;  %160 = vmatprep.mubr.msk.bf16.mxu0 %vm174_vm1, %v173_v0  ;;  %20 = vst.msk [vmem:[#allocation2] sm:$0xff] %vm19_vm0, %v173_v0  ;;  %21 = vst.msk [vmem:[#allocation2 + $0x8] sm:$0xff] %vm19_vm0, %v173_v0  ;;  %v167_v2 = vld [vmem:[%s217_s1] sm:$0xff]   ;;  %vm137_vm3 = vcmask 519168  }
   0x2   :  { %157 = vmatpush3.bf16.msra.mxu0 %v166_v1  ;;  %v168_v3 = vld [vmem:[%s218_s0] sm:$0xff]  }
   0x3   :  { %158 = vmatprep.subr.bf16.mxu0 %v173_v0  ;;  %v148_v12 = vld [vmem:[%s219_s2] ss:$0 sm:$0xff] }
   0x6   :  { %159 = vmatpush3.bf16.msra.mxu0 %v167_v2 }
   0x8   :  { %v22_v4 = vld [vmem:[#allocation2] sm:$0xff]  ;;  %v23_v8 = vld [vmem:[#allocation2 + $0x8] sm:$0xff] }
   0x9   :  { %161 = vmatmul.mubr.msk.bf16.vlgmr.msra.gmra.mxu0 %vm47_vm2, %v168_v3 }
  0xc9   :  { %v85_v5 = vpop.f32.mrf.mxu0 }
  0xca   :  { %v92_v6 = vadd.f32 %v85_v5, %v22_v4 }
  0xcb   :  { %v162_v7 = vpop.f32.mrf.mxu0 }
  0xcc   :  { %95 = vst.msk [vmem:[#allocation2] sm:$0xff] %vm19_vm0, %v92_v6 }
  0xcd   :  { %v88_v9 = vpop.f32.mrf.mxu0 }
  0xce   :  { %v93_v10 = vadd.f32 %v88_v9, %v23_v8 }
  0xcf   :  { %v163_v11 = vpop.f32.mrf.mxu0 }
  0xd0   :  { %96 = vst.msk [vmem:[#allocation2 + $0x8] sm:$0xff] %vm19_vm0, %v93_v10 }
  0xd3   :  { %v100_v13 = vld [vmem:[#allocation2] sm:$0xff] }
  0xd4   :  { %v109_v14 = vadd.f32 %v148_v12, %v100_v13 }
  0xd6   :  { %v111_v15 = vmul.f32 %v109_v14, %v109_v14 }
  0xd7   :  { %v101_v16 = vld [vmem:[#allocation2 + $0x8] sm:$0xff] }
  0xd8   :  { %v113_v17 = vmul.f32 %v111_v15, %v109_v14  ;;  %v110_v18 = vadd.f32 %v148_v12, %v101_v16 }
  0xda   :  { %v115_v19 = vmul.f32 0.044715, %v113_v17  ;;  %v112_v20 = vmul.f32 %v110_v18, %v110_v18 }
  0xdc   :  { %v117_v21 = vadd.f32 %v115_v19, %v109_v14  ;;  %v114_v22 = vmul.f32 %v112_v20, %v110_v18 }
  0xde   :  { %v119_v23 = vmul.f32 0.7978846, %v117_v21  ;;  %v116_v24 = vmul.f32 0.044715, %v114_v22 }
  0xe0   :  { %169 = vtanh.f32 %v119_v23  ;;  %v118_v25 = vadd.f32 %v116_v24, %v110_v18 }
  0xe2   :  { %v120_v26 = vmul.f32 0.7978846, %v118_v25 }
  0xe4   :  { %171 = vtanh.f32 %v120_v26 }
  0xed   :  { %v170_v27 = vpop.eup %169 }
  0xee   :  { %v123_v28 = vadd.f32 1.0, %v170_v27 }
  0xf0   :  { %v125_v29 = vmul.f32 0.5, %v123_v28 }
  0xf1   :  { %v172_v30 = vpop.eup %171 }
  0xf2   :  { %v127_v31 = vmul.f32 %v125_v29, %v109_v14  ;;  %v124_v32 = vadd.f32 1.0, %v172_v30 }
  0xf4   :  { %v151_v33 = vpack.c.bf16 %v127_v31, %v127_v31  ;;  %v126_v34 = vmul.f32 0.5, %v124_v32 }
  0xf6   :  { %138 = vst.msk [vmem:[%s220_s3] sm:$0xf] %vm137_vm3, %v151_v33  ;;  %v128_v35 = vmul.f32 %v126_v34, %v110_v18 }
  0xf8   :  { %v152_v36 = vpack.c.bf16 %v128_v35, %v128_v35 }
  0xfa   :  { %139 = vst.msk [vmem:[%s220_s3 + $0x4] sm:$0xf] %vm137_vm3, %v152_v36 }

// kernel: sbert_embedding_forward.23
= control target key start
LH: loop header
LB: loop body
LE: loop exit
PB: predicated region body
PF: predicated region fallthrough
CT: control target
= control target key end

     0   :  { %vm28_vm0 = vcmask 261120   ;;  %v247_v0 = vmov 0.0   ;;  %vm248_vm1 = vmmov 0   ;;  %vm72_vm2 = vcmask 523264   ;;  %s325_s1 = inlined_call_operand.vmem [shape: bf16[64,32], index: 1, kind: input, shape index: {}]   ;;  %s326_s0 = inlined_call_operand.vmem [shape: bf16[16,64], index: 0, kind: input, shape index: {}]   ;;  %s327_s3 = inlined_call_operand.vmem [shape: bf16[16,32], index: 3, kind: input, shape index: {}]   ;;  %s328_s2 = inlined_call_operand.vmem [shape: f32[1,32], index: 2, kind: input, shape index: {}]   ;;  %s329_s4 = inlined_call_operand.vmem [shape: f32[1,32], index: 4, kind: input, shape index: {}]   ;;  %s330_s5 = inlined_call_operand.vmem [shape: f32[1,32], index: 5, kind: input, shape index: {}]   ;;  %s331_s6 = inlined_call_operand.vmem [shape: bf16[16,32], index: 6, kind: output, shape index: {}]  }
   0x1   :  { %224 = vmatprep.subr.bf16.mxu0 %v247_v0  ;;  %v238_v1 = vld [vmem:[%s325_s1 + $0x18] sm:$0xff]   ;;  %232 = vmatprep.mubr.msk.bf16.mxu0 %vm248_vm1, %v247_v0  ;;  %29 = vst.msk [vmem:[#allocation2] sm:$0xff] %vm28_vm0, %v247_v0  ;;  %30 = vst.msk [vmem:[#allocation2 + $0x8] sm:$0xff] %vm28_vm0, %v247_v0  ;;  %v239_v2 = vld [vmem:[%s325_s1 + $0x10] sm:$0xff]   ;;  %vm195_vm3 = vcmask 257024  }
   0x2   :  { %225 = vmatpush3.bf16.msra.mxu0 %v238_v1  ;;  %v240_v3 = vld [vmem:[%s325_s1 + $0x8] sm:$0xff]   ;;  %v241_v4 = vld [vmem:[%s325_s1] sm:$0xff]  }
   0x3   :  { %226 = vmatprep.subr.bf16.mxu0 %v247_v0  ;;  %v242_v5 = vld [vmem:[%s326_s0] sm:$0xff]  }
   0x4   :  { %v216_v14 = vld [vmem:[%s327_s3] sm:$0xff]  }
   0x5   :  { %v208_v15 = vld [vmem:[%s328_s2] ss:$0 sm:$0xff]  ;;  %v217_v16 = vunpack.c.l.bf16 %v216_v14  ;;  %v218_v20 = vunpack.c.h.bf16 %v216_v14 }
   0x6   :  { %227 = vmatpush3.bf16.msra.mxu0 %v239_v2  ;;  %v209_v43 = vld [vmem:[%s329_s4] ss:$0 sm:$0xff] }
   0x7   :  { %228 = vmatprep.subr.bf16.mxu0 %v247_v0  ;;  %v210_v45 = vld [vmem:[%s330_s5] ss:$0 sm:$0xff] }
   0x8   :  { %v31_v6 = vld [vmem:[#allocation2] sm:$0xff]  ;;  %v32_v10 = vld [vmem:[#allocation2 + $0x8] sm:$0xff] }
   0xa   :  { %229 = vmatpush3.bf16.msra.mxu0 %v240_v3 }
   0xb   :  { %230 = vmatprep.subr.bf16.mxu0 %v247_v0 }
   0xe   :  { %231 = vmatpush3.bf16.msra.mxu0 %v241_v4 }
  0x11   :  { %233 = vmatmul.mubr.msk.bf16.vlgmr.msra.gmra.mxu0 %vm72_vm2, %v242_v5 }
  0xd1   :  { %v110_v7 = vpop.f32.mrf.mxu0 }
  0xd2   :  { %v117_v8 = vadd.f32 %v110_v7, %v31_v6 }
  0xd3   :  { %v234_v9 = vpop.f32.mrf.mxu0 }
  0xd4   :  { %120 = vst.msk [vmem:[#allocation2] sm:$0xff] %vm28_vm0, %v117_v8 }
  0xd5   :  { %v113_v11 = vpop.f32.mrf.mxu0 }
  0xd6   :  { %v118_v12 = vadd.f32 %v113_v11, %v32_v10 }
  0xd7   :  { %v235_v13 = vpop.f32.mrf.mxu0 }
  0xd8   :  { %121 = vst.msk [vmem:[#allocation2 + $0x8] sm:$0xff] %vm28_vm0, %v118_v12 }
  0xdb   :  { %v125_v17 = vld [vmem:[#allocation2] sm:$0xff] }
  0xdc   :  { %v134_v18 = vadd.f32 %v208_v15, %v125_v17 }
  0xde   :  { %v140_v19 = vadd.f32 %v217_v16, %v134_v18 }
  0xdf   :  { %v126_v21 = vld [vmem:[#allocation2 + $0x8] sm:$0xff] }
  0xe0   :  { %v142_v22 = vsel %vm28_vm0, %v140_v19, 0.0  ;;  %v135_v23 = vadd.f32 %v208_v15, %v126_v21 }
  0xe1   :  { %143 = vadd.xlane.f32.xlu0 %v142_v22 }
  0xe2   :  { %v141_v24 = vadd.f32 %v218_v20, %v135_v23 }
  0xe4   :  { %v145_v25 = vsel %vm28_vm0, %v141_v24, 0.0 }
  0xe5   :  { %146 = vadd.xlane.f32.xlu0 %v145_v25 }
 0x16a   :  { %v144_v26 = vpop.xlane.xlu0 %143 }
 0x16b   :  { %v149_v27 = vmul.f32 0.03125, %v144_v26 }
 0x16d   :  { %v151_v28 = vsub.f32 %v140_v19, %v149_v27 }
 0x16e   :  { %v147_v29 = vpop.xlane.xlu0 %146 }
 0x16f   :  { %v150_v30 = vmul.f32 0.03125, %v147_v29  ;;  %v153_v31 = vmul.f32 %v151_v28, %v151_v28 }
 0x171   :  { %v152_v32 = vsub.f32 %v141_v24, %v150_v30  ;;  %v155_v33 = vsel %vm28_vm0, %v153_v31, 0.0 }
 0x172   :  { %156 = vadd.xlane.f32.xlu1 %v155_v33 }
 0x173   :  { %v154_v34 = vmul.f32 %v152_v32, %v152_v32 }
 0x175   :  { %v158_v35 = vsel %vm28_vm0, %v154_v34, 0.0 }
 0x176   :  { %159 = vadd.xlane.f32.xlu1 %v158_v35 }
 0x1fb   :  { %v157_v36 = vpop.xlane.xlu1 %156 }
 0x1fc   :  { %v161_v37 = vmul.f32 0.03125, %v157_v36 }
 0x1fe   :  { %v163_v38 = vadd.f32 1e-12, %v161_v37 }
 0x1ff   :  { %v160_v39 = vpop.xlane.xlu1 %159 }
 0x200   :  { %243 = vrsqrt.f32 %v163_v38  ;;  %v162_v40 = vmul.f32 0.03125, %v160_v39 }
 0x202   :  { %v164_v41 = vadd.f32 1e-12, %v162_v40 }
 0x204   :  { %245 = vrsqrt.f32 %v164_v41 }
 0x20d   :  { %v244_v42 = vpop.eup %243 }
 0x20e   :  { %v167_v44 = vmul.f32 %v244_v42, %v151_v28 }
 0x210   :  { %v176_v46 = vmul.f32 %v209_v43, %v167_v44 }
 0x211   :  { %v246_v47 = vpop.eup %245 }
 0x212   :  { %v185_v48 = vadd.f32 %v210_v45, %v176_v46  ;;  %v168_v49 = vmul.f32 %v246_v47, %v152_v32 }
 0x214   :  { %v213_v50 = vpack.c.bf16 %v185_v48, %v185_v48  ;;  %v177_v51 = vmul.f32 %v209_v43, %v168_v49 }
 0x216   :  { %196 = vst.msk [vmem:[%s331_s6] sm:$0xf] %vm195_vm3, %v213_v50  ;;  %v186_v52 = vadd.f32 %v210_v45, %v177_v51 }
 0x218   :  { %v214_v53 = vpack.c.bf16 %v186_v52, %v186_v52 }
 0x21a   :  { %197 = vst.msk [vmem:[%s331_s6 + $0x4] sm:$0xf] %vm195_vm3, %v214_v53 }

// kernel: sbert_embedding_forward.31
= control target key start
LH: loop header
LB: loop body
LE: loop exit
PB: predicated region body
PF: predicated region fallthrough
CT: control target
= control target key end

     0   :  { %vm63_vm0 = vcmask 7168   ;;  %v146_v2 = vmov 0   ;;  %vm18_vm1 = vcmask 1024   ;;  %v147_v7 = vmov 0.0   ;;  %s183_s0 = inlined_call_operand.vmem [shape: bf16[2,8,32], index: 0, kind: input, shape index: {}]   ;;  %s184_s1 = inlined_call_operand.vmem [shape: f32[2,8,1], index: 1, kind: input, shape index: {}]   ;;  %s185_s2 = inlined_call_operand.hbm [shape: f32[2,32], index: 2, kind: output, shape index: {}]  }
   0x1   :  { %v24_v0 = vld [vmem:[%s184_s1] sm:$0xff]  ;;  %v25_v1 = vld [vmem:[%s184_s1 + $0x8] sm:$0xff]  ;;  %120 = vset.pattern.permute.xlu0 %v146_v2  ;;  %121 = vset.pattern.permute.xlu1 %v146_v2  ;;  %19 = vst.msk [vmem:[#allocation3] sm:$0x3] %vm18_vm1, %v147_v7 }
   0x2   :  { %v64_v3 = vsel %vm63_vm0, %v24_v0, 0.0  ;;  %v71_v4 = vsel %vm63_vm0, %v25_v1, 0.0  ;;  %29 = vperm.xlu0 %120, %v24_v0  }
   0x3   :  { %v65_v5 = vrot.slane %v64_v3, 4  ;;  %v72_v6 = vrot.slane %v71_v4, 4 }
   0x4   :  { %7 = vsyncpa [#allocation5], 0  ;;  %vm16_vm2 = vcmask 254976   ;;  %vm56_vm3 = vcmask 1041409   ;;  %v114_v23 = vld [vmem:[%s183_s0] sm:$0xff]   ;;  %vm39_vm4 = vcmask 261120  }
   0x5   :  { %v66_v8 = vadd.f32 %v65_v5, %v64_v3  ;;  %v73_v9 = vadd.f32 %v72_v6, %v71_v4  ;;  %17 = vst.msk [vmem:[#allocation2] sm:$0x3] %vm16_vm2, %v147_v7  ;;  %v115_v24 = vunpack.c.l.bf16 %v114_v23  ;;  %v116_v27 = vunpack.c.h.bf16 %v114_v23  ;;  %s148_s0 = smov [#allocation4]  }
   0x6   :  { %34 = vperm.xlu0 %120, %v25_v1   ;;  %s105_s14 = sshll.u32 %s148_s0, 4  ;;  %s106_s14 = int_to_ptr.vmem [resolvable:$true] %s105_s14 }
   0x7   :  { %v67_v10 = vrot.slane %v66_v8, 2  ;;  %v74_v11 = vrot.slane %v73_v9, 2  ;;  %s124_s15 = scalar_lea.vmem %s106_s14, 32  ;;  %p129_p1 = scmp.lt.s32.totalorder %s106_s14, %s106_s14 }
   0x8   :  { %v62_v18 = vld [vmem:[#allocation3] sm:$0x3]  ;;  %p125_p0 = scmp.ne.s32.totalorder %s106_s14, %s124_s15  ;;  %p130_p2 = scmp.lt.s32.totalorder %s124_s15, %s124_s15 }
   0x9   :  { %v68_v12 = vadd.f32 %v67_v10, %v66_v8  ;;  %v75_v13 = vadd.f32 %v74_v11, %v73_v9 }
   0xa   :  { %p131_p3 = por %p130_p2, %p129_p1 }
   0xb   :  { %v69_v14 = vrot.slane %v68_v12, 1  ;;  %v76_v15 = vrot.slane %v75_v13, 1 }
   0xc   :  { %v26_v44 = vld [vmem:[#allocation2] sm:$0x3]  ;;  %p132_p4 = pnand %p131_p3, %p125_p0 }
   0xd   :  { %v70_v16 = vadd.f32 %v69_v14, %v68_v12  ;;  %v77_v17 = vadd.f32 %v76_v15, %v75_v13 }
   0xf   :  { %v80_v19 = vsel %vm56_vm3, %v77_v17, %v70_v16 }
  0x10   :  { %v82_v20 = vadd.f32 %v80_v19, %v62_v18 }
  0x12   :  { %84 = vst.msk [vmem:[#allocation3] sm:$0x3] %vm18_vm1, %v82_v20 }
  0x19   :  { %v89_v21 = vld [vmem:[#allocation3] sm:$0x3] }
  0x1a   :  { %v90_v22 = vmax.f32 %v89_v21, 1e-09 }
  0x1c   :  { %93 = vperm.xlu1 %121, %v90_v22  }
  0x7d   :  { %v30_v25 = vpop.permute.xlu0 %29 }
  0x7e   :  { %v37_v26 = vmul.f32 %v115_v24, %v30_v25 }
  0x80   :  { %v40_v28 = vsel %vm39_vm4, %v37_v26, 0.0 }
  0x81   :  { %v41_v29 = vrot.slane %v40_v28, 4  ;;  %v35_v30 = vpop.permute.xlu0 %34 }
  0x82   :  { %v38_v31 = vmul.f32 %v116_v27, %v35_v30 }
  0x83   :  { %v42_v32 = vadd.f32 %v41_v29, %v40_v28 }
  0x84   :  { %v47_v33 = vsel %vm39_vm4, %v38_v31, 0.0 }
  0x85   :  { %v43_v34 = vrot.slane %v42_v32, 2  ;;  %v48_v35 = vrot.slane %v47_v33, 4 }
  0x87   :  { %v44_v36 = vadd.f32 %v43_v34, %v42_v32  ;;  %v49_v37 = vadd.f32 %v48_v35, %v47_v33 }
  0x89   :  { %v45_v38 = vrot.slane %v44_v36, 1  ;;  %v50_v39 = vrot.slane %v49_v37, 2 }
  0x8b   :  { %v51_v40 = vadd.f32 %v50_v39, %v49_v37  ;;  %v46_v41 = vadd.f32 %v45_v38, %v44_v36 }
  0x8d   :  { %v52_v42 = vrot.slane %v51_v40, 1 }
  0x8f   :  { %v53_v43 = vadd.f32 %v52_v42, %v51_v40 }
  0x91   :  { %v57_v45 = vsel %vm56_vm3, %v53_v43, %v46_v41 }
  0x92   :  { %v59_v46 = vadd.f32 %v57_v45, %v26_v44 }
  0x94   :  { %61 = vst.msk [vmem:[#allocation2] sm:$0x3] %vm16_vm2, %v59_v46 }
  0x97   :  { %v94_v47 = vpop.permute.xlu1 %93 }
  0x98   :  { %122 = vrcp.f32 %v94_v47 }
  0x9b   :  { %v88_v49 = vld [vmem:[#allocation2] sm:$0x3] }
  0xa5   :  { %v123_v48 = vpop.eup %122 }
  0xa6   :  { %v97_v50 = vmul.f32 %v123_v48, %v88_v49 }
  0xa8   :  { %98 = vst.msk [vmem:[#allocation4] sm:$0x3] %vm16_vm2, %v97_v50 }
  0xa9   :  { %135 = shalt.err (!%p132_p4)
}
  0xaa   :  { %108 = dma.vmem_to_hbm [thread:$0]  %s106_s14, 32, %s185_s2, [#allocation5]  }
  0xab   :  { %144 = dma.done.wait [#allocation5], 32  }
  0xac   :  { %145 = vsyncadd [#allocation5], 4294967264 }
  0xad   :  { %112 = vsyncpa [#allocation5], 1 }

</bundles_post_ra>
